<compile_context>
chip_gen: v7x
topology: tpu7x:2x2x1
jax: 0.10.0
libtpu: 0.0.40
codegen_flags: <defaults>
</compile_context>

<pallas_src>
import functools

import jax
import jax.numpy as jnp
from jax.experimental import pallas as pl
from jax.experimental.pallas import tpu as pltpu


# ----------------------------------------------------------------------------
# Generation-aware VMEM budget
# ----------------------------------------------------------------------------
_FALLBACK_VMEM_CAP = 64 * 1024 * 1024   # v7x physical VMEM; conservative for all gens


def _vmem_limit_bytes():
    try:
        info = pltpu.get_tpu_info()
        cap = int(getattr(info, "vmem_capacity_bytes", 0)) or _FALLBACK_VMEM_CAP
    except Exception:
        cap = _FALLBACK_VMEM_CAP
    # Leave headroom for Mosaic's own scratch: ~48 MiB on v7x, <= 96 MiB on v5e/v6e.
    return min((cap * 3) // 4, 96 * 1024 * 1024)


# ----------------------------------------------------------------------------
# Kernel 1: grouped conv (groups == in_channels), no bias, NHWC channel-last.
# One grid step = one batch element x one output-channel block (ct lanes).
# ----------------------------------------------------------------------------
def _depthwise_nhwc_kernel(x_ref, w_ref, o_ref, xp_ref, *,
                           K, pad, H, W, Ho, Wo, RC, n_chunks):
    """x_ref:  (1, H, W, ct)     input plane, channels pre-replicated to out-channel order
       w_ref:  (K*K, 1, ct)      per-lane taps for this channel block (f32)
       o_ref:  (1, Ho, Wo, ct)   output block
       xp_ref: (Hp, Wp, ct) f32  zero-haloed VMEM scratch plane
    """
    Hp = H + 2 * pad
    Wp = W + 2 * pad
    ct = x_ref.shape[3]

    # --- zero halo + plane load into the f32 scratch -------------------------
    # Channels (lanes) are untouched by padding -> no lane-misaligned relayout;
    # the W halo is a sublane-only offset paid once per plane.  Borders are
    # rewritten every step (scratch persists across steps / per-core on v7x).
    if pad > 0:
        zrow = jnp.zeros((pad, Wp, ct), jnp.float32)
        zcol = jnp.zeros((Hp, pad, ct), jnp.float32)
        xp_ref[0:pad, :, :] = zrow
        xp_ref[Hp - pad:Hp, :, :] = zrow
        xp_ref[:, 0:pad, :] = zcol
        xp_ref[:, Wp - pad:Wp, :] = zcol
    xp_ref[pad:pad + H, pad:pad + W, :] = x_ref[0].astype(jnp.float32)

    # Per-lane taps for this channel block, loaded once (K*K tiny (1, ct) rows).
    taps = [w_ref[t] for t in range(K * K)]

    # --- row-chunked accumulation --------------------------------------------
    def row_chunk(rc_idx, carry):
        # Clamp the final chunk so any Ho works; overlapping writes are idempotent.
        r0 = jnp.minimum(rc_idx * RC, Ho - RC)
        acc = jnp.zeros((RC, Wo, ct), jnp.float32)
        for kh in range(K):          # small fixed K*K tap loop: keep unrolled
            for kw in range(K):
                xs = xp_ref[pl.ds(r0 + kh, RC), kw:kw + Wo, :]   # sublane-only shift
                acc = acc + xs * taps[kh * K + kw]               # per-lane FMA
        o_ref[0, pl.ds(r0, RC), :, :] = acc.astype(o_ref.dtype)
        return carry

    jax.lax.fori_loop(0, n_chunks, row_chunk, 0)


def _pick_channel_block(batch, Cout, H, W, Ho, Wo, pad, itemsize, budget_bytes):
    """Largest legal channel block (multiple of 128 dividing Cout, or Cout) whose
    per-step footprint (double-buffered in/out blocks + f32 halo scratch) fits."""
    cands = sorted({Cout} | {c for c in range(128, Cout, 128) if Cout % c == 0},
                   reverse=True)
    Hp, Wp = H + 2 * pad, W + 2 * pad

    def step_bytes(ct):
        in_b = H * W * ct * itemsize
        out_b = Ho * Wo * ct * itemsize
        halo = Hp * Wp * ct * 4
        return 2 * (in_b + out_b) + halo     # 2x: BlockSpec double-buffering

    fitting = [c for c in cands if step_bytes(c) <= budget_bytes]
    if not fitting:
        return cands[-1]   # smallest legal block; correctness first
    if batch < 2:
        # v7x megacore: prefer >= 2 grid steps when batch alone cannot provide them.
        sub = [c for c in fitting if c < Cout]
        if sub:
            return sub[0]
    return fitting[0]


def _pick_row_chunk(Ho, Wo, ct, override=None):
    if override is not None:
        return max(1, min(int(override), Ho))
    target = 128 * 1024                      # f32 accumulator bytes per chunk
    rc = max(1, target // (Wo * ct * 4))
    return int(min(rc, Ho))


def grouped_conv(x, weight, *, row_chunk_rows=None):
    """x: (B, Cin, H, W); weight: (Cout, 1, K, K); groups == Cin; no bias."""
    B, Cin, H, W = x.shape
    Cout, wcin, K, K2 = weight.shape
    assert wcin == 1 and K2 == K
    assert Cout % Cin == 0, "groups==in_channels requires Cout % Cin == 0"
    cm = Cout // Cin
    pad = K // 2
    Ho = H + 2 * pad - K + 1
    Wo = W + 2 * pad - K + 1
    Hp, Wp = H + 2 * pad, W + 2 * pad

    # --- NHWC layout plumbing (one-off XLA ops in the wrapper) ---------------
    x_nhwc = jnp.transpose(x, (0, 2, 3, 1))                # (B, H, W, Cin)
    if cm > 1:
        # lane oc of the replicated input <-> input channel oc // cm (PyTorch group order)
        x_nhwc = jnp.repeat(x_nhwc, cm, axis=-1)           # (B, H, W, Cout)
    # w_lane[kh*K+kw, 0, oc] = weight[oc, 0, kh, kw]
    w_lane = jnp.transpose(weight[:, 0], (1, 2, 0)).reshape(K * K, 1, Cout)
    w_lane = w_lane.astype(jnp.float32)

    vmem_limit = _vmem_limit_bytes()
    budget = (vmem_limit * 3) // 4
    ct = _pick_channel_block(B, Cout, H, W, Ho, Wo, pad, x.dtype.itemsize, budget)
    RC = _pick_row_chunk(Ho, Wo, ct, row_chunk_rows)
    n_chunks = pl.cdiv(Ho, RC)

    kernel = functools.partial(
        _depthwise_nhwc_kernel,
        K=K, pad=pad, H=H, W=W, Ho=Ho, Wo=Wo, RC=RC, n_chunks=n_chunks)

    out_nhwc = pl.pallas_call(
        kernel,
        out_shape=jax.ShapeDtypeStruct((B, Ho, Wo, Cout), x.dtype),
        grid=(B, Cout // ct),
        in_specs=[
            pl.BlockSpec((1, H, W, ct), lambda b, c: (b, 0, 0, c)),
            pl.BlockSpec((K * K, 1, ct), lambda b, c: (0, 0, c)),
        ],
        out_specs=pl.BlockSpec((1, Ho, Wo, ct), lambda b, c: (b, 0, 0, c)),
        scratch_shapes=[pltpu.VMEM((Hp, Wp, ct), jnp.float32)],
        compiler_params=pltpu.CompilerParams(
            dimension_semantics=("parallel", "parallel"),
            vmem_limit_bytes=vmem_limit),
    )(x_nhwc, w_lane)

    return jnp.transpose(out_nhwc, (0, 3, 1, 2))           # back to NCHW


# ----------------------------------------------------------------------------
# Kernel 2: weight_transform (1x1 conv). DEAD CODE in the module forward (its
# result never contributes to the output), so it is NOT called by
# ada_conv_forward; kept (tail-safe) and verified for completeness.
# ----------------------------------------------------------------------------
def _pointwise_conv_kernel(x_ref, w_ref, b_ref, o_ref):
    y = jnp.dot(w_ref[...], x_ref[0], preferred_element_type=jnp.float32)
    o_ref[0] = (y + b_ref[...]).astype(o_ref.dtype)


def pointwise_conv(x, w, b, *, px_tile=4096):
    """x: (B, Cin, H, W); w: (M, Cin); b: (M,) -> (B, M, H, W)."""
    B, Cin, H, W = x.shape
    M = w.shape[0]
    P = H * W
    t = min(px_tile, pl.cdiv(P, 128) * 128)      # lane-aligned pixel tile
    Pp = pl.cdiv(P, t) * t                       # pad pixel axis to a tile multiple
    xr = x.reshape(B, Cin, P)
    if Pp != P:
        xr = jnp.pad(xr, ((0, 0), (0, 0), (0, Pp - P)))
    out = pl.pallas_call(
        _pointwise_conv_kernel,
        out_shape=jax.ShapeDtypeStruct((B, M, Pp), x.dtype),
        grid=(B, Pp // t),
        in_specs=[
            pl.BlockSpec((1, Cin, t), lambda bi, pi: (bi, 0, pi)),
            pl.BlockSpec((M, Cin), lambda bi, pi: (0, 0)),
            pl.BlockSpec((M, 1), lambda bi, pi: (0, 0)),
        ],
        out_specs=pl.BlockSpec((1, M, t), lambda bi, pi: (bi, 0, pi)),
        compiler_params=pltpu.CompilerParams(
            dimension_semantics=("parallel", "parallel"),
            vmem_limit_bytes=_vmem_limit_bytes()),
    )(xr, w, b.reshape(M, 1))
    if Pp != P:
        out = out[:, :, :P]
    return out.reshape(B, M, H, W)


# ----------------------------------------------------------------------------
# AdaConv forward
# ----------------------------------------------------------------------------
def ada_conv_forward(params, x):
    # The PyTorch forward also computes transformed_weight = weight_transform(x),
    # but that value never contributes to the returned tensor, so the dead
    # branch is not executed here (pointwise_conv() implements it if needed).
    # TODO(synk): self.conv has a bias parameter, but forward calls F.conv2d
    # without it, so no bias is applied here either.
    return grouped_conv(x, params["conv_weight"])


# ----------------------------------------------------------------------------
# Pure-JAX references for verification
# ----------------------------------------------------------------------------
def _ref_grouped_conv(x, w, groups, pad):
    return jax.lax.conv_general_dilated(
        x, w, window_strides=(1, 1), padding=((pad, pad), (pad, pad)),
        dimension_numbers=("NCHW", "OIHW", "NCHW"),
        feature_group_count=groups)


def _ref_pointwise(x, w, b):
    return jnp.einsum("mc,bchw->bmhw", w, x) + b[None, :, None, None]


if __name__ == "__main__":
    B, Cin, Cout, K, H, W = 2, 4, 8, 3, 16, 16
    M = Cout * K * K

    key = jax.random.PRNGKey(0)
    k1, k2, k3, k4 = jax.random.split(key, 4)
    params = {
        # nn.Conv2d(in, out, K, groups=in) weight: (Cout, Cin/groups=1, K, K)
        "conv_weight": jax.random.normal(k1, (Cout, 1, K, K), jnp.float32) * 0.1,
        # nn.Conv2d(in, Cout*K*K, kernel_size=1) weight/bias (1x1 -> (M, Cin))
        "wt_weight": jax.random.normal(k2, (M, Cin), jnp.float32) * 0.1,
        "wt_bias": jax.random.normal(k3, (M,), jnp.float32) * 0.1,
    }
    x = jax.random.normal(k4, (B, Cin, H, W), jnp.float32)

    # --- forward hot path ---
    out = jax.block_until_ready(ada_conv_forward(params, x))
    ref_out = _ref_grouped_conv(x, params["conv_weight"], groups=Cin, pad=K // 2)
    assert out.shape == (B, Cout, H, W)
    assert jnp.allclose(out, ref_out, atol=1e-4, rtol=1e-4), "grouped conv mismatch"

    # --- even-K sanity check (padding=K//2 semantics, output grows by 1) ---
    w_even = jax.random.normal(k1, (Cin, 1, 2, 2), jnp.float32) * 0.1
    out_e = jax.block_until_ready(grouped_conv(x, w_even))
    ref_e = _ref_grouped_conv(x, w_even, groups=Cin, pad=1)
    assert out_e.shape == (B, Cin, H + 1, W + 1)
    assert jnp.allclose(out_e, ref_e, atol=1e-4, rtol=1e-4), "even-K mismatch"

    # --- forced row-chunking (fori_loop + clamped final chunk), odd H ---
    H2, W2 = 19, 20
    x2 = jax.random.normal(k4, (B, Cin, H2, W2), jnp.float32)
    out_c = jax.block_until_ready(
        grouped_conv(x2, params["conv_weight"], row_chunk_rows=5))
    ref_c = _ref_grouped_conv(x2, params["conv_weight"], groups=Cin, pad=K // 2)
    assert jnp.allclose(out_c, ref_c, atol=1e-4, rtol=1e-4), "row-chunk mismatch"

    # --- bf16 activations (f32 accumulation, bf16 store) ---
    xb = x.astype(jnp.bfloat16)
    out_b = jax.block_until_ready(grouped_conv(xb, params["conv_weight"]))
    ref_b = _ref_grouped_conv(xb.astype(jnp.float32), params["conv_weight"],
                              groups=Cin, pad=K // 2)
    assert out_b.dtype == jnp.bfloat16
    assert jnp.allclose(out_b.astype(jnp.float32), ref_b, atol=5e-2, rtol=5e-2), \
        "bf16 grouped conv mismatch"

    # --- weight_transform kernel (dead code in forward, verified separately) ---
    tw = jax.block_until_ready(pointwise_conv(x, params["wt_weight"], params["wt_bias"]))
    ref_tw = _ref_pointwise(x, params["wt_weight"], params["wt_bias"])
    assert jnp.allclose(tw, ref_tw, atol=1e-4, rtol=1e-4), "weight_transform mismatch"

    print("KERNEL_OK")
</pallas_src>

<mosaic_0001>
module attributes {stable_mosaic.version = 11 : i64} {
  func.func @_depthwise_nhwc_kernel(%arg0: i32, %arg1: i32, %arg2: memref<1x16x16x8xf32, #tpu.memory_space<vmem>>, %arg3: memref<9x1x8xf32, #tpu.memory_space<vmem>>, %arg4: memref<1x16x16x8xf32, #tpu.memory_space<vmem>>, %arg5: memref<18x18x8xf32, #tpu.memory_space<vmem>>) attributes {dimension_semantics = [#tpu.dimension_semantics<parallel>, #tpu.dimension_semantics<parallel>], iteration_bounds = array<i64: 2, 1>, scalar_prefetch = 0 : i64, scratch_operands = 1 : i64, tpu.core_type = #tpu.core_type<tc>, window_params = [{transform_indices = @transform_0, window_bounds = array<i64: 1, 16, 16, 8>}, {transform_indices = @transform_1, window_bounds = array<i64: 9, 1, 8>}, {transform_indices = @transform_2, window_bounds = array<i64: 1, 16, 16, 8>}]} {
    %cst = arith.constant 0.000000e+00 : f32
    %0 = vector.broadcast %cst : f32 to vector<1x18x8xf32>
    %cst_0 = arith.constant 0.000000e+00 : f32
    %1 = vector.broadcast %cst_0 : f32 to vector<18x1x8xf32>
    %c0 = arith.constant 0 : index
    %c0_1 = arith.constant 0 : index
    %c0_2 = arith.constant 0 : index
    %2 = vector.load %arg5[%c0, %c0_1, %c0_2] : memref<18x18x8xf32, #tpu.memory_space<vmem>>, vector<1x18x8xf32>
    tpu.vector_store %arg5[%c0, %c0_1, %c0_2], %0 {strides = array<i32>} : memref<18x18x8xf32, #tpu.memory_space<vmem>>, vector<1x18x8xf32>,
    %c17 = arith.constant 17 : index
    %c0_3 = arith.constant 0 : index
    %c0_4 = arith.constant 0 : index
    %3 = vector.load %arg5[%c17, %c0_3, %c0_4] : memref<18x18x8xf32, #tpu.memory_space<vmem>>, vector<1x18x8xf32>
    tpu.vector_store %arg5[%c17, %c0_3, %c0_4], %0 {strides = array<i32>} : memref<18x18x8xf32, #tpu.memory_space<vmem>>, vector<1x18x8xf32>,
    %c0_5 = arith.constant 0 : index
    %c0_6 = arith.constant 0 : index
    %c0_7 = arith.constant 0 : index
    %4 = vector.load %arg5[%c0_5, %c0_6, %c0_7] : memref<18x18x8xf32, #tpu.memory_space<vmem>>, vector<18x1x8xf32>
    tpu.vector_store %arg5[%c0_5, %c0_6, %c0_7], %1 {strides = array<i32>} : memref<18x18x8xf32, #tpu.memory_space<vmem>>, vector<18x1x8xf32>,
    %c0_8 = arith.constant 0 : index
    %c17_9 = arith.constant 17 : index
    %c0_10 = arith.constant 0 : index
    %5 = vector.load %arg5[%c0_8, %c17_9, %c0_10] : memref<18x18x8xf32, #tpu.memory_space<vmem>>, vector<18x1x8xf32>
    tpu.vector_store %arg5[%c0_8, %c17_9, %c0_10], %1 {strides = array<i32>} : memref<18x18x8xf32, #tpu.memory_space<vmem>>, vector<18x1x8xf32>,
    %c0_11 = arith.constant 0 : index
    %c0_12 = arith.constant 0 : index
    %c0_13 = arith.constant 0 : index
    %c0_14 = arith.constant 0 : index
    %6 = vector.load %arg2[%c0_11, %c0_12, %c0_13, %c0_14] : memref<1x16x16x8xf32, #tpu.memory_space<vmem>>, vector<1x16x16x8xf32>
    %7 = vector.shape_cast %6 : vector<1x16x16x8xf32> to vector<16x16x8xf32>
    %c1 = arith.constant 1 : index
    %c1_15 = arith.constant 1 : index
    %c0_16 = arith.constant 0 : index
    %8 = vector.load %arg5[%c1, %c1_15, %c0_16] : memref<18x18x8xf32, #tpu.memory_space<vmem>>, vector<16x16x8xf32>
    tpu.vector_store %arg5[%c1, %c1_15, %c0_16], %7 {strides = array<i32>} : memref<18x18x8xf32, #tpu.memory_space<vmem>>, vector<16x16x8xf32>,
    %c0_17 = arith.constant 0 : index
    %c0_18 = arith.constant 0 : index
    %c0_19 = arith.constant 0 : index
    %9 = vector.load %arg3[%c0_17, %c0_18, %c0_19] : memref<9x1x8xf32, #tpu.memory_space<vmem>>, vector<1x1x8xf32>
    %10 = vector.shape_cast %9 : vector<1x1x8xf32> to vector<1x8xf32>
    %c1_20 = arith.constant 1 : index
    %c0_21 = arith.constant 0 : index
    %c0_22 = arith.constant 0 : index
    %11 = vector.load %arg3[%c1_20, %c0_21, %c0_22] : memref<9x1x8xf32, #tpu.memory_space<vmem>>, vector<1x1x8xf32>
    %12 = vector.shape_cast %11 : vector<1x1x8xf32> to vector<1x8xf32>
    %c2 = arith.constant 2 : index
    %c0_23 = arith.constant 0 : index
    %c0_24 = arith.constant 0 : index
    %13 = vector.load %arg3[%c2, %c0_23, %c0_24] : memref<9x1x8xf32, #tpu.memory_space<vmem>>, vector<1x1x8xf32>
    %14 = vector.shape_cast %13 : vector<1x1x8xf32> to vector<1x8xf32>
    %c3 = arith.constant 3 : index
    %c0_25 = arith.constant 0 : index
    %c0_26 = arith.constant 0 : index
    %15 = vector.load %arg3[%c3, %c0_25, %c0_26] : memref<9x1x8xf32, #tpu.memory_space<vmem>>, vector<1x1x8xf32>
    %16 = vector.shape_cast %15 : vector<1x1x8xf32> to vector<1x8xf32>
    %c4 = arith.constant 4 : index
    %c0_27 = arith.constant 0 : index
    %c0_28 = arith.constant 0 : index
    %17 = vector.load %arg3[%c4, %c0_27, %c0_28] : memref<9x1x8xf32, #tpu.memory_space<vmem>>, vector<1x1x8xf32>
    %18 = vector.shape_cast %17 : vector<1x1x8xf32> to vector<1x8xf32>
    %c5 = arith.constant 5 : index
    %c0_29 = arith.constant 0 : index
    %c0_30 = arith.constant 0 : index
    %19 = vector.load %arg3[%c5, %c0_29, %c0_30] : memref<9x1x8xf32, #tpu.memory_space<vmem>>, vector<1x1x8xf32>
    %20 = vector.shape_cast %19 : vector<1x1x8xf32> to vector<1x8xf32>
    %c6 = arith.constant 6 : index
    %c0_31 = arith.constant 0 : index
    %c0_32 = arith.constant 0 : index
    %21 = vector.load %arg3[%c6, %c0_31, %c0_32] : memref<9x1x8xf32, #tpu.memory_space<vmem>>, vector<1x1x8xf32>
    %22 = vector.shape_cast %21 : vector<1x1x8xf32> to vector<1x8xf32>
    %c7 = arith.constant 7 : index
    %c0_33 = arith.constant 0 : index
    %c0_34 = arith.constant 0 : index
    %23 = vector.load %arg3[%c7, %c0_33, %c0_34] : memref<9x1x8xf32, #tpu.memory_space<vmem>>, vector<1x1x8xf32>
    %24 = vector.shape_cast %23 : vector<1x1x8xf32> to vector<1x8xf32>
    %c8 = arith.constant 8 : index
    %c0_35 = arith.constant 0 : index
    %c0_36 = arith.constant 0 : index
    %25 = vector.load %arg3[%c8, %c0_35, %c0_36] : memref<9x1x8xf32, #tpu.memory_space<vmem>>, vector<1x1x8xf32>
    %26 = vector.shape_cast %25 : vector<1x1x8xf32> to vector<1x8xf32>
    %c0_i32 = arith.constant 0 : i32
    %c16_i32 = arith.constant 16 : i32
    %27 = arith.muli %c0_i32, %c16_i32 : i32
    %c0_i32_37 = arith.constant 0 : i32
    %28 = arith.minsi %27, %c0_i32_37 : i32
    %cst_38 = arith.constant 0.000000e+00 : f32
    %29 = vector.broadcast %cst_38 : f32 to vector<16x16x8xf32>
    %c0_i32_39 = arith.constant 0 : i32
    %30 = arith.addi %28, %c0_i32_39 : i32
    %31 = arith.index_cast %30 : i32 to index
    %c0_40 = arith.constant 0 : index
    %c0_41 = arith.constant 0 : index
    %32 = vector.load %arg5[%31, %c0_40, %c0_41] : memref<18x18x8xf32, #tpu.memory_space<vmem>>, vector<16x16x8xf32>
    %33 = vector.shape_cast %10 : vector<1x8xf32> to vector<1x1x8xf32>
    %34 = vector.broadcast %33 : vector<1x1x8xf32> to vector<16x16x8xf32>
    %35 = arith.mulf %32, %34 : vector<16x16x8xf32>
    %36 = arith.addf %29, %35 : vector<16x16x8xf32>
    %c0_i32_42 = arith.constant 0 : i32
    %37 = arith.addi %28, %c0_i32_42 : i32
    %38 = arith.index_cast %37 : i32 to index
    %c1_43 = arith.constant 1 : index
    %c0_44 = arith.constant 0 : index
    %39 = vector.load %arg5[%38, %c1_43, %c0_44] : memref<18x18x8xf32, #tpu.memory_space<vmem>>, vector<16x16x8xf32>
    %40 = vector.shape_cast %12 : vector<1x8xf32> to vector<1x1x8xf32>
    %41 = vector.broadcast %40 : vector<1x1x8xf32> to vector<16x16x8xf32>
    %42 = arith.mulf %39, %41 : vector<16x16x8xf32>
    %43 = arith.addf %36, %42 : vector<16x16x8xf32>
    %c0_i32_45 = arith.constant 0 : i32
    %44 = arith.addi %28, %c0_i32_45 : i32
    %45 = arith.index_cast %44 : i32 to index
    %c2_46 = arith.constant 2 : index
    %c0_47 = arith.constant 0 : index
    %46 = vector.load %arg5[%45, %c2_46, %c0_47] : memref<18x18x8xf32, #tpu.memory_space<vmem>>, vector<16x16x8xf32>
    %47 = vector.shape_cast %14 : vector<1x8xf32> to vector<1x1x8xf32>
    %48 = vector.broadcast %47 : vector<1x1x8xf32> to vector<16x16x8xf32>
    %49 = arith.mulf %46, %48 : vector<16x16x8xf32>
    %50 = arith.addf %43, %49 : vector<16x16x8xf32>
    %c1_i32 = arith.constant 1 : i32
    %51 = arith.addi %28, %c1_i32 : i32
    %52 = arith.index_cast %51 : i32 to index
    %c0_48 = arith.constant 0 : index
    %c0_49 = arith.constant 0 : index
    %53 = vector.load %arg5[%52, %c0_48, %c0_49] : memref<18x18x8xf32, #tpu.memory_space<vmem>>, vector<16x16x8xf32>
    %54 = vector.shape_cast %16 : vector<1x8xf32> to vector<1x1x8xf32>
    %55 = vector.broadcast %54 : vector<1x1x8xf32> to vector<16x16x8xf32>
    %56 = arith.mulf %53, %55 : vector<16x16x8xf32>
    %57 = arith.addf %50, %56 : vector<16x16x8xf32>
    %c1_i32_50 = arith.constant 1 : i32
    %58 = arith.addi %28, %c1_i32_50 : i32
    %59 = arith.index_cast %58 : i32 to index
    %c1_51 = arith.constant 1 : index
    %c0_52 = arith.constant 0 : index
    %60 = vector.load %arg5[%59, %c1_51, %c0_52] : memref<18x18x8xf32, #tpu.memory_space<vmem>>, vector<16x16x8xf32>
    %61 = vector.shape_cast %18 : vector<1x8xf32> to vector<1x1x8xf32>
    %62 = vector.broadcast %61 : vector<1x1x8xf32> to vector<16x16x8xf32>
    %63 = arith.mulf %60, %62 : vector<16x16x8xf32>
    %64 = arith.addf %57, %63 : vector<16x16x8xf32>
    %c1_i32_53 = arith.constant 1 : i32
    %65 = arith.addi %28, %c1_i32_53 : i32
    %66 = arith.index_cast %65 : i32 to index
    %c2_54 = arith.constant 2 : index
    %c0_55 = arith.constant 0 : index
    %67 = vector.load %arg5[%66, %c2_54, %c0_55] : memref<18x18x8xf32, #tpu.memory_space<vmem>>, vector<16x16x8xf32>
    %68 = vector.shape_cast %20 : vector<1x8xf32> to vector<1x1x8xf32>
    %69 = vector.broadcast %68 : vector<1x1x8xf32> to vector<16x16x8xf32>
    %70 = arith.mulf %67, %69 : vector<16x16x8xf32>
    %71 = arith.addf %64, %70 : vector<16x16x8xf32>
    %c2_i32 = arith.constant 2 : i32
    %72 = arith.addi %28, %c2_i32 : i32
    %73 = arith.index_cast %72 : i32 to index
    %c0_56 = arith.constant 0 : index
    %c0_57 = arith.constant 0 : index
    %74 = vector.load %arg5[%73, %c0_56, %c0_57] : memref<18x18x8xf32, #tpu.memory_space<vmem>>, vector<16x16x8xf32>
    %75 = vector.shape_cast %22 : vector<1x8xf32> to vector<1x1x8xf32>
    %76 = vector.broadcast %75 : vector<1x1x8xf32> to vector<16x16x8xf32>
    %77 = arith.mulf %74, %76 : vector<16x16x8xf32>
    %78 = arith.addf %71, %77 : vector<16x16x8xf32>
    %c2_i32_58 = arith.constant 2 : i32
    %79 = arith.addi %28, %c2_i32_58 : i32
    %80 = arith.index_cast %79 : i32 to index
    %c1_59 = arith.constant 1 : index
    %c0_60 = arith.constant 0 : index
    %81 = vector.load %arg5[%80, %c1_59, %c0_60] : memref<18x18x8xf32, #tpu.memory_space<vmem>>, vector<16x16x8xf32>
    %82 = vector.shape_cast %24 : vector<1x8xf32> to vector<1x1x8xf32>
    %83 = vector.broadcast %82 : vector<1x1x8xf32> to vector<16x16x8xf32>
    %84 = arith.mulf %81, %83 : vector<16x16x8xf32>
    %85 = arith.addf %78, %84 : vector<16x16x8xf32>
    %c2_i32_61 = arith.constant 2 : i32
    %86 = arith.addi %28, %c2_i32_61 : i32
    %87 = arith.index_cast %86 : i32 to index
    %c2_62 = arith.constant 2 : index
    %c0_63 = arith.constant 0 : index
    %88 = vector.load %arg5[%87, %c2_62, %c0_63] : memref<18x18x8xf32, #tpu.memory_space<vmem>>, vector<16x16x8xf32>
    %89 = vector.shape_cast %26 : vector<1x8xf32> to vector<1x1x8xf32>
    %90 = vector.broadcast %89 : vector<1x1x8xf32> to vector<16x16x8xf32>
    %91 = arith.mulf %88, %90 : vector<16x16x8xf32>
    %92 = arith.addf %85, %91 : vector<16x16x8xf32>
    %c0_64 = arith.constant 0 : index
    %93 = arith.index_cast %28 : i32 to index
    %c0_65 = arith.constant 0 : index
    %c0_66 = arith.constant 0 : index
    %94 = vector.load %arg4[%c0_64, %93, %c0_65, %c0_66] : memref<1x16x16x8xf32, #tpu.memory_space<vmem>>, vector<1x16x16x8xf32>
    %95 = vector.shape_cast %94 : vector<1x16x16x8xf32> to vector<16x16x8xf32>
    %96 = vector.shape_cast %92 : vector<16x16x8xf32> to vector<1x16x16x8xf32>
    tpu.vector_store %arg4[%c0_64, %93, %c0_65, %c0_66], %96 {strides = array<i32>} : memref<1x16x16x8xf32, #tpu.memory_space<vmem>>, vector<1x16x16x8xf32>,
    %c1_i32_67 = arith.constant 1 : i32
    return
  }
  func.func @transform_0(%arg0: i32, %arg1: i32) -> (i32, i32, i32, i32) {
    %c0_i32 = arith.constant 0 : i32
    %c0_i32_0 = arith.constant 0 : i32
    %c0_i32_1 = arith.constant 0 : i32
    return %arg0, %c0_i32, %c0_i32_0, %arg1 : i32, i32, i32, i32
  }
  func.func @transform_1(%arg0: i32, %arg1: i32) -> (i32, i32, i32) {
    %c0_i32 = arith.constant 0 : i32
    %c0_i32_0 = arith.constant 0 : i32
    %c0_i32_1 = arith.constant 0 : i32
    return %c0_i32, %c0_i32_0, %arg1 : i32, i32, i32
  }
  func.func @transform_2(%arg0: i32, %arg1: i32) -> (i32, i32, i32, i32) {
    %c0_i32 = arith.constant 0 : i32
    %c0_i32_0 = arith.constant 0 : i32
    %c0_i32_1 = arith.constant 0 : i32
    return %arg0, %c0_i32, %c0_i32_0, %arg1 : i32, i32, i32, i32
  }
}

</mosaic_0001>

<bundles_post_ra>
// kernel: tpu_custom_call.1
= control target key start
LH: loop header
LB: loop body
LE: loop exit
PB: predicated region body
PF: predicated region fallthrough
CT: control target
= control target key end

     0   :  { %s1469_s9 = smov 0   ;;  %s1471_s10 = smov 0   ;;  %s2125_s0 = inlined_call_operand.vmem [shape: f32[2,16,16,8], index: 0, kind: input, shape index: {}]   ;;  %s2126_s1 = inlined_call_operand.vmem [shape: f32[9,1,8], index: 1, kind: input, shape index: {}]   ;;  %s2127_s2 = inlined_call_operand.vmem [shape: f32[2,16,16,8], index: 2, kind: output, shape index: {}]  }
   0x1   :  { %s1473_s11 = smov 0  }
   0x2 LB: > { %s24_s12 = sadd.s32 1, %s1447_s10  ;;  %p1369_p0 = scmp.ge.s32.totalorder %s1451_s11, 1  ;;  %s1451_s11 = sphi %s1473_s11, %s12_s11   ;;  %s1447_s10 = sphi %s1471_s10, %s2129_s10   ;;  %s1443_s9 = sphi %s1469_s9, %s2128_s9  }
   0x3   : > { %p26_p1 = scmp.ge.s32.totalorder %s24_s12, 2  ;;  %p139_p2 = scmp.lt.s32.totalorder %s1451_s11, 3 }
   0x5   : > { %s2131_s12 = smov (%p26_p1, %s24_s12), 0  ;;  %p140_p3 = pnand %p1369_p0, %p139_p2 }
   0x6   : > { %vm189_vm0 = vcmask (!%p140_p3), 64512   ;;  %vm192_vm1 = vcmask (!%p140_p3), 58368   ;;  %vm198_vm2 = vcmask (!%p140_p3), 57344   ;;  %p170_p4 = scmp.lt.s32.totalorder (!%p140_p3), %s1443_s9, 1  ;;  %v1453_v0 = vmov (!%p140_p3), 0.0  }
   0x7   : > { %143 = sbr.rel (%p140_p3) target bundleno = 182 (0xb6), region = 28  ;;  %190 = vst.msk [vmem:[#allocation2] sm:$0xff] (!%p140_p3), %vm189_vm0, %v1453_v0  ;;  %191 = vst.msk [vmem:[#allocation2 + $0x8] sm:$0xff] (!%p140_p3), %vm189_vm0, %v1453_v0  ;;  %v1585_v22 = vld [vmem:[%s2126_s1] ss:$0 sm:$0xff] (!%p140_p3) }
   0x8   : > { %195 = vst.msk [vmem:[#allocation2 + $0x198] sm:$0xff] (!%p140_p3), %vm189_vm0, %v1453_v0  ;;  %196 = vst.msk [vmem:[#allocation2 + $0x1a0] sm:$0xff] (!%p140_p3), %vm189_vm0, %v1453_v0  ;;  %v1596_v26 = vld [vmem:[%s2126_s1 + $0x1] ss:$0 sm:$0xff] (!%p140_p3)  ;;  %v1601_v27 = vld [vmem:[%s2126_s1 + $0x2] ss:$0 sm:$0xff] (!%p140_p3) }
   0x9   : > { %193 = vst.msk [vmem:[#allocation2 + $0x10] sm:$0x3] (!%p140_p3), %vm192_vm1, %v1453_v0  ;;  %197 = vst.msk [vmem:[#allocation2 + $0x1a8] sm:$0x3] (!%p140_p3), %vm192_vm1, %v1453_v0  ;;  %v1618_v34 = vld [vmem:[%s2126_s1 + $0x3] ss:$0 sm:$0xff] (!%p140_p3) }
   0xa   : > { %200 = vst.msk [vmem:[#allocation2 + $0x18] sm:$0x1] (!%p140_p3), %vm198_vm2, %v1453_v0  ;;  %201 = vst.msk [vmem:[#allocation2 + $0x30] sm:$0x1] (!%p140_p3), %vm198_vm2, %v1453_v0  ;;  %v1631_v42 = vld [vmem:[%s2126_s1 + $0x4] ss:$0 sm:$0xff] (!%p140_p3) }
   0xb   : > { %202 = vst.msk [vmem:[#allocation2 + $0x48] sm:$0x1] (!%p140_p3), %vm198_vm2, %v1453_v0  ;;  %203 = vst.msk [vmem:[#allocation2 + $0x60] sm:$0x1] (!%p140_p3), %vm198_vm2, %v1453_v0  ;;  %v1636_v43 = vld [vmem:[%s2126_s1 + $0x5] ss:$0 sm:$0xff] (!%p140_p3) }
   0xc   : > { %204 = vst.msk [vmem:[#allocation2 + $0x78] sm:$0x1] (!%p140_p3), %vm198_vm2, %v1453_v0  ;;  %205 = vst.msk [vmem:[#allocation2 + $0x90] sm:$0x1] (!%p140_p3), %vm198_vm2, %v1453_v0  ;;  %v1644_v48 = vld [vmem:[%s2126_s1 + $0x6] ss:$0 sm:$0xff] (!%p140_p3) }
   0xd   : > { %206 = vst.msk [vmem:[#allocation2 + $0xa8] sm:$0x1] (!%p140_p3), %vm198_vm2, %v1453_v0  ;;  %207 = vst.msk [vmem:[#allocation2 + $0xc0] sm:$0x1] (!%p140_p3), %vm198_vm2, %v1453_v0  ;;  %v1649_v49 = vld [vmem:[%s2126_s1 + $0x7] ss:$0 sm:$0xff] (!%p140_p3) }
   0xe   : > { %208 = vst.msk [vmem:[#allocation2 + $0xd8] sm:$0x1] %vm198_vm2, %v1453_v0  ;;  %209 = vst.msk [vmem:[#allocation2 + $0xf0] sm:$0x1] %vm198_vm2, %v1453_v0  ;;  %s2133_s9 = smov (!%p170_p4, %s1443_s9), 1  ;;  %v419_v39 = vld [vmem:[#allocation2 + $0x1] sm:$0xff] }
   0xf   : > { %210 = vst.msk [vmem:[#allocation2 + $0x108] sm:$0x1] %vm198_vm2, %v1453_v0  ;;  %211 = vst.msk [vmem:[#allocation2 + $0x120] sm:$0x1] %vm198_vm2, %v1453_v0  ;;  %s1393_s13 = sshll.u32 %s2133_s9, 8  ;;  %v521_v40 = vld [vmem:[#allocation2 + $0x2] sm:$0xff]  ;;  %v457_v44 = vmul.f32 %v1596_v26, %v419_v39 }
  0x10   : > { %212 = vst.msk [vmem:[#allocation2 + $0x138] sm:$0x1] %vm198_vm2, %v1453_v0  ;;  %213 = vst.msk [vmem:[#allocation2 + $0x150] sm:$0x1] %vm198_vm2, %v1453_v0  ;;  %s1541_s16 = scalar_lea.vmem %s2125_s0, %s1393_s13  ;;  %v559_v45 = vmul.f32 %v1601_v27, %v521_v40  ;;  %v1654_v50 = vld [vmem:[%s2126_s1 + $0x8] ss:$0 sm:$0xff]  ;;  %s1690_s14 = scalar_lea.vmem %s2127_s2, %s1393_s13 }
  0x11   : > { %214 = vst.msk [vmem:[#allocation2 + $0x168] sm:$0x1] %vm198_vm2, %v1453_v0  ;;  %215 = vst.msk [vmem:[#allocation2 + $0x180] sm:$0x1] %vm198_vm2, %v1453_v0  ;;  %v235_v1 = vld [vmem:[%s1541_s16] sm:$0xff]  ;;  %v236_v2 = vld [vmem:[%s1541_s16 + $0x8] sm:$0xff] }
  0x12   : > { %218 = vst.msk [vmem:[#allocation2 + $0x29] sm:$0x1] %vm198_vm2, %v1453_v0  ;;  %219 = vst.msk [vmem:[#allocation2 + $0x41] sm:$0x1] %vm198_vm2, %v1453_v0  ;;  %v237_v3 = vld [vmem:[%s1541_s16 + $0x10] sm:$0xff]  ;;  %v238_v4 = vld [vmem:[%s1541_s16 + $0x18] sm:$0xff] }
  0x13   : > { %220 = vst.msk [vmem:[#allocation2 + $0x59] sm:$0x1] %vm198_vm2, %v1453_v0  ;;  %221 = vst.msk [vmem:[#allocation2 + $0x71] sm:$0x1] %vm198_vm2, %v1453_v0  ;;  %v239_v5 = vld [vmem:[%s1541_s16 + $0x20] sm:$0xff]  ;;  %v240_v6 = vld [vmem:[%s1541_s16 + $0x28] sm:$0xff] }
  0x14   : > { %222 = vst.msk [vmem:[#allocation2 + $0x89] sm:$0x1] %vm198_vm2, %v1453_v0  ;;  %223 = vst.msk [vmem:[#allocation2 + $0xa1] sm:$0x1] %vm198_vm2, %v1453_v0  ;;  %v241_v7 = vld [vmem:[%s1541_s16 + $0x30] sm:$0xff]  ;;  %v242_v8 = vld [vmem:[%s1541_s16 + $0x38] sm:$0xff] }
  0x15   : > { %224 = vst.msk [vmem:[#allocation2 + $0xb9] sm:$0x1] %vm198_vm2, %v1453_v0  ;;  %225 = vst.msk [vmem:[#allocation2 + $0xd1] sm:$0x1] %vm198_vm2, %v1453_v0  ;;  %v243_v9 = vld [vmem:[%s1541_s16 + $0x40] sm:$0xff]  ;;  %v244_v10 = vld [vmem:[%s1541_s16 + $0x48] sm:$0xff] }
  0x16   : > { %226 = vst.msk [vmem:[#allocation2 + $0xe9] sm:$0x1] %vm198_vm2, %v1453_v0  ;;  %227 = vst.msk [vmem:[#allocation2 + $0x101] sm:$0x1] %vm198_vm2, %v1453_v0  ;;  %v245_v11 = vld [vmem:[%s1541_s16 + $0x50] sm:$0xff]  ;;  %v246_v12 = vld [vmem:[%s1541_s16 + $0x58] sm:$0xff] }
  0x17   : > { %228 = vst.msk [vmem:[#allocation2 + $0x119] sm:$0x1] %vm198_vm2, %v1453_v0  ;;  %229 = vst.msk [vmem:[#allocation2 + $0x131] sm:$0x1] %vm198_vm2, %v1453_v0  ;;  %v247_v13 = vld [vmem:[%s1541_s16 + $0x60] sm:$0xff]  ;;  %v248_v14 = vld [vmem:[%s1541_s16 + $0x68] sm:$0xff] }
  0x18   : > { %230 = vst.msk [vmem:[#allocation2 + $0x149] sm:$0x1] %vm198_vm2, %v1453_v0  ;;  %231 = vst.msk [vmem:[#allocation2 + $0x161] sm:$0x1] %vm198_vm2, %v1453_v0  ;;  %v249_v15 = vld [vmem:[%s1541_s16 + $0x70] sm:$0xff]  ;;  %v250_v16 = vld [vmem:[%s1541_s16 + $0x78] sm:$0xff] }
  0x19   : > { %232 = vst.msk [vmem:[#allocation2 + $0x179] sm:$0x1] %vm198_vm2, %v1453_v0  ;;  %233 = vst.msk [vmem:[#allocation2 + $0x191] sm:$0x1] %vm198_vm2, %v1453_v0  ;;  %v251_v17 = vld [vmem:[%s1541_s16 + $0x80] sm:$0xff]  ;;  %v252_v18 = vld [vmem:[%s1541_s16 + $0x88] sm:$0xff] }
  0x1a   : > { %199 = vst.msk [vmem:[#allocation2] sm:$0x1] %vm198_vm2, %v1453_v0  ;;  %216 = vst.msk [vmem:[#allocation2 + $0x198] sm:$0x1] %vm198_vm2, %v1453_v0  ;;  %v253_v19 = vld [vmem:[%s1541_s16 + $0x90] sm:$0xff]  ;;  %v254_v20 = vld [vmem:[%s1541_s16 + $0x98] sm:$0xff] }
  0x1b   : > { %217 = vst.msk [vmem:[#allocation2 + $0x11] sm:$0x1] %vm198_vm2, %v1453_v0  ;;  %234 = vst.msk [vmem:[#allocation2 + $0x1a9] sm:$0x1] %vm198_vm2, %v1453_v0  ;;  %v255_v21 = vld [vmem:[%s1541_s16 + $0xa0] sm:$0xff]  ;;  %v256_v23 = vld [vmem:[%s1541_s16 + $0xa8] sm:$0xff] }
  0x1c   : > { %268 = vst.msk [vmem:[#allocation2 + $0x19] sm:$0xff] %vm189_vm0, %v235_v1  ;;  %269 = vst.msk [vmem:[#allocation2 + $0x21] sm:$0xff] %vm189_vm0, %v236_v2  ;;  %v257_v24 = vld [vmem:[%s1541_s16 + $0xb0] sm:$0xff]  ;;  %v258_v25 = vld [vmem:[%s1541_s16 + $0xb8] sm:$0xff] }
  0x1d   : > { %270 = vst.msk [vmem:[#allocation2 + $0x31] sm:$0xff] %vm189_vm0, %v237_v3  ;;  %271 = vst.msk [vmem:[#allocation2 + $0x39] sm:$0xff] %vm189_vm0, %v238_v4  ;;  %v259_v28 = vld [vmem:[%s1541_s16 + $0xc0] sm:$0xff]  ;;  %v260_v29 = vld [vmem:[%s1541_s16 + $0xc8] sm:$0xff] }
  0x1e   : > { %272 = vst.msk [vmem:[#allocation2 + $0x49] sm:$0xff] %vm189_vm0, %v239_v5  ;;  %273 = vst.msk [vmem:[#allocation2 + $0x51] sm:$0xff] %vm189_vm0, %v240_v6  ;;  %v261_v30 = vld [vmem:[%s1541_s16 + $0xd0] sm:$0xff]  ;;  %v262_v31 = vld [vmem:[%s1541_s16 + $0xd8] sm:$0xff] }
  0x1f   : > { %274 = vst.msk [vmem:[#allocation2 + $0x61] sm:$0xff] %vm189_vm0, %v241_v7  ;;  %275 = vst.msk [vmem:[#allocation2 + $0x69] sm:$0xff] %vm189_vm0, %v242_v8  ;;  %v263_v32 = vld [vmem:[%s1541_s16 + $0xe0] sm:$0xff]  ;;  %v264_v33 = vld [vmem:[%s1541_s16 + $0xe8] sm:$0xff] }
  0x20   : > { %276 = vst.msk [vmem:[#allocation2 + $0x79] sm:$0xff] %vm189_vm0, %v243_v9  ;;  %277 = vst.msk [vmem:[#allocation2 + $0x81] sm:$0xff] %vm189_vm0, %v244_v10  ;;  %v265_v35 = vld [vmem:[%s1541_s16 + $0xf0] sm:$0xff]  ;;  %v266_v36 = vld [vmem:[%s1541_s16 + $0xf8] sm:$0xff] }
  0x21   : > { %278 = vst.msk [vmem:[#allocation2 + $0x91] sm:$0xff] %vm189_vm0, %v245_v11  ;;  %279 = vst.msk [vmem:[#allocation2 + $0x99] sm:$0xff] %vm189_vm0, %v246_v12  ;;  %v317_v37 = vld [vmem:[#allocation2] sm:$0xff]  ;;  %v318_v52 = vld [vmem:[#allocation2 + $0x8] sm:$0xff] }
  0x22   : > { %280 = vst.msk [vmem:[#allocation2 + $0xa9] sm:$0xff] %vm189_vm0, %v247_v13  ;;  %281 = vst.msk [vmem:[#allocation2 + $0xb1] sm:$0xff] %vm189_vm0, %v248_v14  ;;  %v355_v38 = vmul.f32 %v1585_v22, %v317_v37  ;;  %v356_v56 = vmul.f32 %v1585_v22, %v318_v52  ;;  %v420_v57 = vld [vmem:[#allocation2 + $0x9] sm:$0xff] }
  0x23   : > { %282 = vst.msk [vmem:[#allocation2 + $0xc1] sm:$0xff] %vm189_vm0, %v249_v15  ;;  %283 = vst.msk [vmem:[#allocation2 + $0xc9] sm:$0xff] %vm189_vm0, %v250_v16  ;;  %v623_v41 = vld [vmem:[#allocation2 + $0x18] sm:$0xff]  ;;  %v522_v58 = vld [vmem:[#allocation2 + $0xa] sm:$0xff]  ;;  %v458_v63 = vmul.f32 %v1596_v26, %v420_v57 }
  0x24   : > { %284 = vst.msk [vmem:[#allocation2 + $0xd9] sm:$0xff] %vm189_vm0, %v251_v17  ;;  %285 = vst.msk [vmem:[#allocation2 + $0xe1] sm:$0xff] %vm189_vm0, %v252_v18  ;;  %v725_v46 = vld [vmem:[#allocation2 + $0x19] sm:$0xff]  ;;  %v357_v47 = vmul.f32 %v1585_v22, %v623_v41  ;;  %v489_v54 = vadd.f32 %v457_v44, %v355_v38  ;;  %v661_v55 = vmul.f32 %v1618_v34, %v623_v41  ;;  %v930_v60 = vld [vmem:[#allocation2 + $0x30] sm:$0xff] }
  0x25   : > { %286 = vst.msk [vmem:[#allocation2 + $0xf1] sm:$0xff] %vm189_vm0, %v253_v19  ;;  %287 = vst.msk [vmem:[#allocation2 + $0xf9] sm:$0xff] %vm189_vm0, %v254_v20  ;;  %v827_v51 = vld [vmem:[#allocation2 + $0x1a] sm:$0xff]  ;;  %v459_v53 = vmul.f32 %v1596_v26, %v725_v46  ;;  %v1032_v61 = vld [vmem:[#allocation2 + $0x31] sm:$0xff]  ;;  %v560_v0 = vmul.f32 %v1601_v27, %v522_v58  ;;  %v763_v3 = vmul.f32 %v1631_v42, %v725_v46 }
  0x26   : > { %288 = vst.msk [vmem:[#allocation2 + $0x109] sm:$0xff] %vm189_vm0, %v255_v21  ;;  %289 = vst.msk [vmem:[#allocation2 + $0x111] sm:$0xff] %vm189_vm0, %v256_v23  ;;  %v624_v59 = vld [vmem:[#allocation2 + $0x20] sm:$0xff]  ;;  %v1134_v62 = vld [vmem:[#allocation2 + $0x32] sm:$0xff]  ;;  %v591_v2 = vadd.f32 %v559_v45, %v489_v54  ;;  %v865_v5 = vmul.f32 %v1636_v43, %v827_v51  ;;  %v490_v6 = vadd.f32 %v458_v63, %v356_v56 }
  0x27   : > { %290 = vst.msk [vmem:[#allocation2 + $0x121] sm:$0xff] %vm189_vm0, %v257_v24  ;;  %291 = vst.msk [vmem:[#allocation2 + $0x129] sm:$0xff] %vm189_vm0, %v258_v25  ;;  %v491_v1 = vadd.f32 %v459_v53, %v357_v47  ;;  %v726_v4 = vld [vmem:[#allocation2 + $0x21] sm:$0xff]  ;;  %v662_v7 = vmul.f32 %v1618_v34, %v624_v59  ;;  %v561_v9 = vmul.f32 %v1601_v27, %v827_v51  ;;  %v931_v14 = vld [vmem:[#allocation2 + $0x38] sm:$0xff] }
  0x28   : > { %292 = vst.msk [vmem:[#allocation2 + $0x139] sm:$0xff] %vm189_vm0, %v259_v28  ;;  %293 = vst.msk [vmem:[#allocation2 + $0x141] sm:$0xff] %vm189_vm0, %v260_v29  ;;  %v828_v8 = vld [vmem:[#allocation2 + $0x22] sm:$0xff]  ;;  %v693_v10 = vadd.f32 %v661_v55, %v591_v2  ;;  %v968_v11 = vmul.f32 %v1644_v48, %v930_v60  ;;  %v1070_v12 = vmul.f32 %v1649_v49, %v1032_v61  ;;  %v1033_v17 = vld [vmem:[#allocation2 + $0x39] sm:$0xff] }
  0x29   : > { %294 = vst.msk [vmem:[#allocation2 + $0x151] sm:$0xff] %vm189_vm0, %v261_v30  ;;  %295 = vst.msk [vmem:[#allocation2 + $0x159] sm:$0xff] %vm189_vm0, %v262_v31  ;;  %v1172_v13 = vmul.f32 %v1654_v50, %v1134_v62  ;;  %v592_v15 = vadd.f32 %v560_v0, %v490_v6  ;;  %v764_v16 = vmul.f32 %v1631_v42, %v726_v4  ;;  %v1135_v23 = vld [vmem:[#allocation2 + $0x3a] sm:$0xff]  ;;  %v1034_v44 = vld [vmem:[#allocation2 + $0x49] sm:$0xff] }
  0x2a   : > { %296 = vst.msk [vmem:[#allocation2 + $0x169] sm:$0xff] %vm189_vm0, %v263_v32  ;;  %297 = vst.msk [vmem:[#allocation2 + $0x171] sm:$0xff] %vm189_vm0, %v264_v33  ;;  %v593_v18 = vadd.f32 %v561_v9, %v491_v1  ;;  %v663_v19 = vmul.f32 %v1618_v34, %v930_v60  ;;  %v795_v20 = vadd.f32 %v763_v3, %v693_v10  ;;  %v1136_v55 = vld [vmem:[#allocation2 + $0x4a] sm:$0xff] }
  0x2b   : > { %298 = vst.msk [vmem:[#allocation2 + $0x181] sm:$0xff] %vm189_vm0, %v265_v35  ;;  %299 = vst.msk [vmem:[#allocation2 + $0x189] sm:$0xff] %vm189_vm0, %v266_v36  ;;  %v866_v21 = vmul.f32 %v1636_v43, %v828_v8  ;;  %v358_v24 = vmul.f32 %v1585_v22, %v624_v59  ;;  %v460_v25 = vmul.f32 %v1596_v26, %v726_v4  ;;  %v932_v35 = vld [vmem:[#allocation2 + $0x48] sm:$0xff]  ;;  %v933_v1 = vld [vmem:[#allocation2 + $0x50] sm:$0xff] }
  0x2c   : > { %v694_v28 = vadd.f32 %v662_v7, %v592_v15  ;;  %v969_v29 = vmul.f32 %v1644_v48, %v931_v14  ;;  %v695_v30 = vadd.f32 %v663_v19, %v593_v18  ;;  %v765_v31 = vmul.f32 %v1631_v42, %v1032_v61  ;;  %v1035_v9 = vld [vmem:[#allocation2 + $0x51] sm:$0xff] }
  0x2d   : > { %v897_v32 = vadd.f32 %v865_v5, %v795_v20  ;;  %v1071_v33 = vmul.f32 %v1649_v49, %v1033_v17  ;;  %v492_v36 = vadd.f32 %v460_v25, %v358_v24  ;;  %v562_v37 = vmul.f32 %v1601_v27, %v828_v8 }
  0x2e   : > { %v796_v38 = vadd.f32 %v764_v16, %v694_v28  ;;  %v1173_v39 = vmul.f32 %v1654_v50, %v1135_v23  ;;  %v797_v40 = vadd.f32 %v765_v31, %v695_v30  ;;  %v867_v41 = vmul.f32 %v1636_v43, %v1134_v62  ;;  %v934_v28 = vld [vmem:[#allocation2 + $0x60] sm:$0xff] }
  0x2f   : > { %v1000_v45 = vadd.f32 %v968_v11, %v897_v32  ;;  %v594_v46 = vadd.f32 %v562_v37, %v492_v36  ;;  %v664_v47 = vmul.f32 %v1618_v34, %v931_v14  ;;  %v359_v51 = vmul.f32 %v1585_v22, %v930_v60  ;;  %v1138_v37 = vld [vmem:[#allocation2 + $0x62] sm:$0xff] }
  0x30   : > { %v898_v52 = vadd.f32 %v866_v21, %v796_v38  ;;  %v899_v53 = vadd.f32 %v867_v41, %v797_v40  ;;  %v970_v54 = vmul.f32 %v1644_v48, %v932_v35  ;;  %v461_v56 = vmul.f32 %v1596_v26, %v1032_v61 }
  0x31   : > { %v1102_v57 = vadd.f32 %v1070_v12, %v1000_v45  ;;  %v1072_v58 = vmul.f32 %v1649_v49, %v1034_v44  ;;  %v696_v59 = vadd.f32 %v664_v47, %v594_v46  ;;  %v766_v63 = vmul.f32 %v1631_v42, %v1033_v17 }
  0x32   : > { %v1001_v60 = vadd.f32 %v969_v29, %v898_v52  ;;  %v1002_v0 = vadd.f32 %v970_v54, %v899_v53  ;;  %v493_v2 = vadd.f32 %v461_v56, %v359_v51  ;;  %v563_v3 = vmul.f32 %v1601_v27, %v1134_v62  ;;  %v1137_v62 = vld [vmem:[#allocation2 + $0x52] sm:$0xff]  ;;  %v1036_v29 = vld [vmem:[#allocation2 + $0x61] sm:$0xff]  ;;  %v1037_v53 = vld [vmem:[#allocation2 + $0x69] sm:$0xff] }
  0x33   : > { %v1204_v61 = vadd.f32 %v1172_v13, %v1102_v57  ;;  %v1174_v4 = vmul.f32 %v1654_v50, %v1136_v55  ;;  %v798_v5 = vadd.f32 %v766_v63, %v696_v59  ;;  %v868_v6 = vmul.f32 %v1636_v43, %v1135_v23  ;;  %v935_v52 = vld [vmem:[#allocation2 + $0x68] sm:$0xff] }
  0x34   : > { %v1103_v7 = vadd.f32 %v1071_v33, %v1001_v60  ;;  %v1104_v8 = vadd.f32 %v1072_v58, %v1002_v0  ;;  %v595_v10 = vadd.f32 %v563_v3, %v493_v2  ;;  %v665_v11 = vmul.f32 %v1618_v34, %v932_v35  ;;  %v1139_v63 = vld [vmem:[#allocation2 + $0x6a] sm:$0xff] }
  0x35   : > { %1236 = vst.msk [vmem:[%s1690_s14] sm:$0xff] %vm189_vm0, %v1204_v61  ;;  %v900_v12 = vadd.f32 %v868_v6, %v798_v5  ;;  %v971_v15 = vmul.f32 %v1644_v48, %v933_v1  ;;  %v360_v13 = vmul.f32 %v1585_v22, %v931_v14  ;;  %v462_v16 = vmul.f32 %v1596_v26, %v1033_v17 }
  0x36   : > { %v1205_v18 = vadd.f32 %v1173_v39, %v1103_v7  ;;  %v1206_v19 = vadd.f32 %v1174_v4, %v1104_v8  ;;  %v697_v20 = vadd.f32 %v665_v11, %v595_v10  ;;  %v767_v21 = vmul.f32 %v1631_v42, %v1034_v44  ;;  %v936_v7 = vld [vmem:[#allocation2 + $0x78] sm:$0xff] }
  0x37   : > { %v1003_v24 = vadd.f32 %v971_v15, %v900_v12  ;;  %v1073_v25 = vmul.f32 %v1649_v49, %v1035_v9  ;;  %v494_v30 = vadd.f32 %v462_v16, %v360_v13  ;;  %v564_v31 = vmul.f32 %v1601_v27, %v1135_v23  ;;  %v1038_v8 = vld [vmem:[#allocation2 + $0x79] sm:$0xff] }
  0x38   : > { %1237 = vst.msk [vmem:[%s1690_s14 + $0x8] sm:$0xff] %vm189_vm0, %v1205_v18  ;;  %1238 = vst.msk [vmem:[%s1690_s14 + $0x10] sm:$0xff] %vm189_vm0, %v1206_v19  ;;  %v1175_v14 = vmul.f32 %v1654_v50, %v1137_v62  ;;  %v799_v17 = vadd.f32 %v767_v21, %v697_v20  ;;  %v869_v32 = vmul.f32 %v1636_v43, %v1136_v55  ;;  %v1727_v10 = vld [vmem:[#allocation2 + $0x7a] sm:$0xff] }
  0x39   : > { %v666_v33 = vmul.f32 %v1618_v34, %v933_v1  ;;  %v1105_v36 = vadd.f32 %v1073_v25, %v1003_v24  ;;  %v596_v38 = vadd.f32 %v564_v31, %v494_v30  ;;  %v361_v39 = vmul.f32 %v1585_v22, %v932_v35  ;;  %v937_v20 = vld [vmem:[#allocation2 + $0x80] sm:$0xff] }
  0x3a   : > { %v463_v40 = vmul.f32 %v1596_v26, %v1034_v44  ;;  %v901_v23 = vadd.f32 %v869_v32, %v799_v17  ;;  %v972_v41 = vmul.f32 %v1644_v48, %v934_v28  ;;  %v1074_v45 = vmul.f32 %v1649_v49, %v1036_v29 }
  0x3b   : > { %v768_v46 = vmul.f32 %v1631_v42, %v1035_v9  ;;  %v1207_v47 = vadd.f32 %v1175_v14, %v1105_v36  ;;  %v698_v51 = vadd.f32 %v666_v33, %v596_v38  ;;  %v565_v56 = vmul.f32 %v1601_v27, %v1136_v55  ;;  %v1039_v33 = vld [vmem:[#allocation2 + $0x81] sm:$0xff] }
  0x3c   : > { %v495_v54 = vadd.f32 %v463_v40, %v361_v39  ;;  %v1004_v57 = vadd.f32 %v972_v41, %v901_v23  ;;  %v1176_v35 = vmul.f32 %v1654_v50, %v1138_v37  ;;  %v870_v58 = vmul.f32 %v1636_v43, %v1137_v62  ;;  %v1141_v38 = vld [vmem:[#allocation2 + $0x82] sm:$0xff] }
  0x3d   : > { %v667_v44 = vmul.f32 %v1618_v34, %v934_v28  ;;  %1239 = vst.msk [vmem:[%s1690_s14 + $0x18] sm:$0xff] %vm189_vm0, %v1207_v47  ;;  %v800_v59 = vadd.f32 %v768_v46, %v698_v51  ;;  %v362_v0 = vmul.f32 %v1585_v22, %v933_v1  ;;  %v464_v2 = vmul.f32 %v1596_v26, %v1035_v9 }
  0x3e   : > { %v597_v60 = vadd.f32 %v565_v56, %v495_v54  ;;  %v1106_v3 = vadd.f32 %v1074_v45, %v1004_v57  ;;  %v973_v61 = vmul.f32 %v1644_v48, %v935_v52  ;;  %v1075_v55 = vmul.f32 %v1649_v49, %v1037_v53  ;;  %v938_v54 = vld [vmem:[#allocation2 + $0x90] sm:$0xff] }
  0x3f   : > { %v769_v4 = vmul.f32 %v1631_v42, %v1036_v29  ;;  %v902_v5 = vadd.f32 %v870_v58, %v800_v59  ;;  %v496_v11 = vadd.f32 %v464_v2, %v362_v0  ;;  %v566_v12 = vmul.f32 %v1601_v27, %v1137_v62  ;;  %v1040_v59 = vld [vmem:[#allocation2 + $0x91] sm:$0xff] }
  0x40   : > { %v699_v6 = vadd.f32 %v667_v44, %v597_v60  ;;  %v1208_v1 = vadd.f32 %v1176_v35, %v1106_v3  ;;  %v1177_v9 = vmul.f32 %v1654_v50, %v1139_v63  ;;  %v871_v15 = vmul.f32 %v1636_v43, %v1138_v37  ;;  %v1755_v60 = vld [vmem:[#allocation2 + $0x92] sm:$0xff] }
  0x41   : > { %v668_v13 = vmul.f32 %v1618_v34, %v935_v52  ;;  %v1005_v16 = vadd.f32 %v973_v61, %v902_v5  ;;  %v598_v19 = vadd.f32 %v566_v12, %v496_v11  ;;  %v363_v21 = vmul.f32 %v1585_v22, %v934_v28 }
  0x42   : > { %v801_v18 = vadd.f32 %v769_v4, %v699_v6  ;;  %1240 = vst.msk [vmem:[%s1690_s14 + $0x20] sm:$0xff] %vm189_vm0, %v1208_v1  ;;  %v974_v24 = vmul.f32 %v1644_v48, %v936_v7  ;;  %v1076_v25 = vmul.f32 %v1649_v49, %v1038_v8  ;;  %v1178_v62 = vmul.f32 %v1654_v50, %v1727_v10 }
  0x43   : > { %v465_v30 = vmul.f32 %v1596_v26, %v1036_v29  ;;  %v1107_v31 = vadd.f32 %v1075_v55, %v1005_v16  ;;  %v700_v17 = vadd.f32 %v668_v13, %v598_v19  ;;  %v770_v32 = vmul.f32 %v1631_v42, %v1037_v53  ;;  %v1041_v16 = vld [vmem:[#allocation2 + $0x99] sm:$0xff] }
  0x44   : > { %v903_v14 = vadd.f32 %v871_v15, %v801_v18  ;;  %v872_v28 = vmul.f32 %v1636_v43, %v1139_v63  ;;  %v975_v36 = vmul.f32 %v1644_v48, %v937_v20  ;;  %v567_v40 = vmul.f32 %v1601_v27, %v1138_v37 }
  0x45   : > { %v497_v39 = vadd.f32 %v465_v30, %v363_v21  ;;  %v1209_v23 = vadd.f32 %v1177_v9, %v1107_v31  ;;  %v802_v45 = vadd.f32 %v770_v32, %v700_v17  ;;  %v364_v29 = vmul.f32 %v1585_v22, %v935_v52  ;;  %v1143_v31 = vld [vmem:[#allocation2 + $0x9a] sm:$0xff] }
  0x46   : > { %v1006_v41 = vadd.f32 %v974_v24, %v903_v14  ;;  %v1077_v46 = vmul.f32 %v1649_v49, %v1039_v33  ;;  %v669_v51 = vmul.f32 %v1618_v34, %v936_v7  ;;  %v466_v56 = vmul.f32 %v1596_v26, %v1037_v53 }
  0x47   : > { %v599_v47 = vadd.f32 %v567_v40, %v497_v39  ;;  %1241 = vst.msk [vmem:[%s1690_s14 + $0x28] sm:$0xff] %vm189_vm0, %v1209_v23  ;;  %v904_v35 = vadd.f32 %v872_v28, %v802_v45  ;;  %v1179_v58 = vmul.f32 %v1654_v50, %v1141_v38  ;;  %v771_v37 = vmul.f32 %v1631_v42, %v1038_v8  ;;  %v1780_v45 = vld [vmem:[#allocation2 + $0xaa] sm:$0xff] }
  0x48   : > { %v1108_v57 = vadd.f32 %v1076_v25, %v1006_v41  ;;  %v873_v52 = vmul.f32 %v1636_v43, %v1727_v10  ;;  %v498_v0 = vadd.f32 %v466_v56, %v364_v29  ;;  %v568_v2 = vmul.f32 %v1601_v27, %v1139_v63  ;;  %v1042_v41 = vld [vmem:[#allocation2 + $0xa9] sm:$0xff] }
  0x49   : > { %v701_v44 = vadd.f32 %v669_v51, %v599_v47  ;;  %v1007_v3 = vadd.f32 %v975_v36, %v904_v35  ;;  %v976_v61 = vmul.f32 %v1644_v48, %v938_v54  ;;  %v365_v55 = vmul.f32 %v1585_v22, %v936_v7  ;;  %v939_v7 = vld [vmem:[#allocation2 + $0x98] sm:$0xff] }
  0x4a   : > { %v1210_v53 = vadd.f32 %v1178_v62, %v1108_v57  ;;  %v600_v5 = vadd.f32 %v568_v2, %v498_v0  ;;  %v670_v6 = vmul.f32 %v1618_v34, %v937_v20  ;;  %v467_v11 = vmul.f32 %v1596_v26, %v1038_v8 }
  0x4b   : > { %v803_v4 = vadd.f32 %v771_v37, %v701_v44  ;;  %v1109_v12 = vadd.f32 %v1077_v46, %v1007_v3  ;;  %v1078_v1 = vmul.f32 %v1649_v49, %v1040_v59  ;;  %v1180_v63 = vmul.f32 %v1654_v50, %v1755_v60 }
  0x4c   : > { %1242 = vst.msk [vmem:[%s1690_s14 + $0x30] sm:$0xff] %vm189_vm0, %v1210_v53  ;;  %v772_v9 = vmul.f32 %v1631_v42, %v1039_v33  ;;  %v702_v13 = vadd.f32 %v670_v6, %v600_v5  ;;  %v499_v18 = vadd.f32 %v467_v11, %v365_v55  ;;  %v569_v19 = vmul.f32 %v1601_v27, %v1727_v10  ;;  %v1145_v5 = vld [vmem:[#allocation2 + $0xb2] sm:$0xff] }
  0x4d   : > { %v905_v15 = vadd.f32 %v873_v52, %v803_v4  ;;  %v1211_v8 = vadd.f32 %v1179_v58, %v1109_v12  ;;  %v874_v21 = vmul.f32 %v1636_v43, %v1141_v38  ;;  %v671_v24 = vmul.f32 %v1618_v34, %v938_v54  ;;  %v941_v58 = vld [vmem:[#allocation2 + $0xb0] sm:$0xff] }
  0x4e   : > { %v366_v25 = vmul.f32 %v1585_v22, %v937_v20  ;;  %v804_v30 = vadd.f32 %v772_v9, %v702_v13  ;;  %v601_v14 = vadd.f32 %v569_v19, %v499_v18  ;;  %v468_v17 = vmul.f32 %v1596_v26, %v1039_v33  ;;  %v940_v20 = vld [vmem:[#allocation2 + $0xa8] sm:$0xff]  ;;  %v942_v18 = vld [vmem:[#allocation2 + $0xc0] sm:$0xff] }
  0x4f   : > { %v1008_v62 = vadd.f32 %v976_v61, %v905_v15  ;;  %1243 = vst.msk [vmem:[%s1690_s14 + $0x38] sm:$0xff] %vm189_vm0, %v1211_v8  ;;  %v977_v32 = vmul.f32 %v1644_v48, %v939_v7  ;;  %v1079_v28 = vmul.f32 %v1649_v49, %v1041_v16  ;;  %v773_v10 = vmul.f32 %v1631_v42, %v1040_v59  ;;  %v1043_v61 = vld [vmem:[#allocation2 + $0xb1] sm:$0xff] }
  0x50   : > { %v570_v36 = vmul.f32 %v1601_v27, %v1141_v38  ;;  %v906_v40 = vadd.f32 %v874_v21, %v804_v30  ;;  %v703_v23 = vadd.f32 %v671_v24, %v601_v14  ;;  %v500_v29 = vadd.f32 %v468_v17, %v366_v25  ;;  %v1809_v30 = vld [vmem:[#allocation2 + $0xc2] sm:$0xff] }
  0x51   : > { %v1110_v39 = vadd.f32 %v1078_v1, %v1008_v62  ;;  %v1181_v33 = vmul.f32 %v1654_v50, %v1143_v31  ;;  %v875_v46 = vmul.f32 %v1636_v43, %v1755_v60  ;;  %v672_v47 = vmul.f32 %v1618_v34, %v939_v7  ;;  %v1044_v62 = vld [vmem:[#allocation2 + $0xc1] sm:$0xff] }
  0x52   : > { %v367_v51 = vmul.f32 %v1585_v22, %v938_v54  ;;  %v1009_v38 = vadd.f32 %v977_v32, %v906_v40  ;;  %v805_v57 = vadd.f32 %v773_v10, %v703_v23  ;;  %v602_v35 = vadd.f32 %v570_v36, %v500_v29 }
  0x53   : > { %v1212_v56 = vadd.f32 %v1180_v63, %v1110_v39  ;;  %v978_v37 = vmul.f32 %v1644_v48, %v940_v20  ;;  %v1080_v44 = vmul.f32 %v1649_v49, %v1042_v41  ;;  %v1182_v52 = vmul.f32 %v1654_v50, %v1780_v45 }
  0x54   : > { %v469_v0 = vmul.f32 %v1596_v26, %v1040_v59  ;;  %v1111_v2 = vadd.f32 %v1079_v28, %v1009_v38  ;;  %v907_v53 = vadd.f32 %v875_v46, %v805_v57  ;;  %v704_v3 = vadd.f32 %v672_v47, %v602_v35 }
  0x55   : > { %1244 = vst.msk [vmem:[%s1690_s14 + $0x40] sm:$0xff] %vm189_vm0, %v1212_v56  ;;  %v774_v54 = vmul.f32 %v1631_v42, %v1041_v16  ;;  %v876_v55 = vmul.f32 %v1636_v43, %v1143_v31  ;;  %v979_v4 = vmul.f32 %v1644_v48, %v941_v58  ;;  %v571_v11 = vmul.f32 %v1601_v27, %v1755_v60  ;;  %v1045_v56 = vld [vmem:[#allocation2 + $0xc9] sm:$0xff] }
  0x56   : > { %v501_v6 = vadd.f32 %v469_v0, %v367_v51  ;;  %v1213_v12 = vadd.f32 %v1181_v33, %v1111_v2  ;;  %v1010_v59 = vadd.f32 %v978_v37, %v907_v53  ;;  %v368_v63 = vmul.f32 %v1585_v22, %v939_v7  ;;  %v1147_v2 = vld [vmem:[#allocation2 + $0xca] sm:$0xff] }
  0x57   : > { %v806_v1 = vadd.f32 %v774_v54, %v704_v3  ;;  %v1081_v9 = vmul.f32 %v1649_v49, %v1043_v61  ;;  %v673_v13 = vmul.f32 %v1618_v34, %v940_v20  ;;  %v470_v19 = vmul.f32 %v1596_v26, %v1041_v16 }
  0x58   : > { %v603_v15 = vadd.f32 %v571_v11, %v501_v6  ;;  %1245 = vst.msk [vmem:[%s1690_s14 + $0x48] sm:$0xff] %vm189_vm0, %v1213_v12  ;;  %v1112_v8 = vadd.f32 %v1080_v44, %v1010_v59  ;;  %v1183_v24 = vmul.f32 %v1654_v50, %v1145_v5  ;;  %v775_v60 = vmul.f32 %v1631_v42, %v1042_v41  ;;  %v1046_v59 = vld [vmem:[#allocation2 + $0xd9] sm:$0xff] }
  0x59   : > { %v908_v21 = vadd.f32 %v876_v55, %v806_v1  ;;  %v877_v7 = vmul.f32 %v1636_v43, %v1780_v45  ;;  %v502_v14 = vadd.f32 %v470_v19, %v368_v63  ;;  %v572_v17 = vmul.f32 %v1601_v27, %v1143_v31  ;;  %v1834_v1 = vld [vmem:[#allocation2 + $0xda] sm:$0xff] }
  0x5a   : > { %v705_v25 = vadd.f32 %v673_v13, %v603_v15  ;;  %v1214_v16 = vadd.f32 %v1182_v52, %v1112_v8  ;;  %v980_v28 = vmul.f32 %v1644_v48, %v942_v18  ;;  %v369_v10 = vmul.f32 %v1585_v22, %v940_v20  ;;  %v943_v20 = vld [vmem:[#allocation2 + $0xc8] sm:$0xff] }
  0x5b   : > { %v1011_v32 = vadd.f32 %v979_v4, %v908_v21  ;;  %v604_v39 = vadd.f32 %v572_v17, %v502_v14  ;;  %v674_v40 = vmul.f32 %v1618_v34, %v941_v58  ;;  %v471_v23 = vmul.f32 %v1596_v26, %v1042_v41 }
  0x5c   : > { %v807_v36 = vadd.f32 %v775_v60, %v705_v25  ;;  %1246 = vst.msk [vmem:[%s1690_s14 + $0x50] sm:$0xff] %vm189_vm0, %v1214_v16  ;;  %v1082_v33 = vmul.f32 %v1649_v49, %v1044_v62  ;;  %v1184_v31 = vmul.f32 %v1654_v50, %v1809_v30  ;;  %v776_v46 = vmul.f32 %v1631_v42, %v1043_v61 }
  0x5d   : > { %v1113_v29 = vadd.f32 %v1081_v9, %v1011_v32  ;;  %v706_v51 = vadd.f32 %v674_v40, %v604_v39  ;;  %v503_v38 = vadd.f32 %v471_v23, %v369_v10  ;;  %v573_v57 = vmul.f32 %v1601_v27, %v1780_v45  ;;  %v1149_v39 = vld [vmem:[#allocation2 + $0xe2] sm:$0xff] }
  0x5e   : > { %v909_v47 = vadd.f32 %v877_v7, %v807_v36  ;;  %v878_v35 = vmul.f32 %v1636_v43, %v1145_v5  ;;  %v675_v37 = vmul.f32 %v1618_v34, %v942_v18  ;;  %v370_v44 = vmul.f32 %v1585_v22, %v941_v58  ;;  %v944_v58 = vld [vmem:[#allocation2 + $0xd8] sm:$0xff] }
  0x5f   : > { %v1215_v41 = vadd.f32 %v1183_v24, %v1113_v29  ;;  %v808_v0 = vadd.f32 %v776_v46, %v706_v51  ;;  %v605_v53 = vadd.f32 %v573_v57, %v503_v38  ;;  %v472_v3 = vmul.f32 %v1596_v26, %v1043_v61  ;;  %v945_v24 = vld [vmem:[#allocation2 + $0xe0] sm:$0xff]  ;;  %v946_v38 = vld [vmem:[#allocation2 + $0xf0] sm:$0xff] }
  0x60   : > { %v1012_v52 = vadd.f32 %v980_v28, %v909_v47  ;;  %v981_v54 = vmul.f32 %v1644_v48, %v943_v20  ;;  %v1083_v55 = vmul.f32 %v1649_v49, %v1045_v56  ;;  %v777_v45 = vmul.f32 %v1631_v42, %v1044_v62  ;;  %v1047_v28 = vld [vmem:[#allocation2 + $0xe1] sm:$0xff] }
  0x61   : > { %1247 = vst.msk [vmem:[%s1690_s14 + $0x58] sm:$0xff] %vm189_vm0, %v1215_v41  ;;  %v574_v4 = vmul.f32 %v1601_v27, %v1145_v5  ;;  %v910_v11 = vadd.f32 %v878_v35, %v808_v0  ;;  %v707_v12 = vadd.f32 %v675_v37, %v605_v53  ;;  %v504_v63 = vadd.f32 %v472_v3, %v370_v44  ;;  %v1863_v0 = vld [vmem:[#allocation2 + $0xf2] sm:$0xff] }
  0x62   : > { %v1114_v6 = vadd.f32 %v1082_v33, %v1012_v52  ;;  %v1185_v61 = vmul.f32 %v1654_v50, %v1147_v2  ;;  %v879_v9 = vmul.f32 %v1636_v43, %v1809_v30  ;;  %v676_v15 = vmul.f32 %v1618_v34, %v943_v20  ;;  %v1048_v52 = vld [vmem:[#allocation2 + $0xf1] sm:$0xff] }
  0x63   : > { %v371_v13 = vmul.f32 %v1585_v22, %v942_v18  ;;  %v1013_v5 = vadd.f32 %v981_v54, %v910_v11  ;;  %v809_v8 = vadd.f32 %v777_v45, %v707_v12  ;;  %v606_v21 = vadd.f32 %v574_v4, %v504_v63 }
  0x64   : > { %v1216_v19 = vadd.f32 %v1184_v31, %v1114_v6  ;;  %v982_v60 = vmul.f32 %v1644_v48, %v944_v58  ;;  %v1084_v25 = vmul.f32 %v1649_v49, %v1046_v59  ;;  %v1186_v7 = vmul.f32 %v1654_v50, %v1834_v1 }
  0x65   : > { %v473_v14 = vmul.f32 %v1596_v26, %v1044_v62  ;;  %v1115_v17 = vadd.f32 %v1083_v55, %v1013_v5  ;;  %v911_v16 = vadd.f32 %v879_v9, %v809_v8  ;;  %v708_v32 = vadd.f32 %v676_v15, %v606_v21 }
  0x66   : > { %1248 = vst.msk [vmem:[%s1690_s14 + $0x60] sm:$0xff] %vm189_vm0, %v1216_v19  ;;  %v778_v18 = vmul.f32 %v1631_v42, %v1045_v56  ;;  %v880_v10 = vmul.f32 %v1636_v43, %v1147_v2  ;;  %v983_v36 = vmul.f32 %v1644_v48, %v945_v24  ;;  %v575_v23 = vmul.f32 %v1601_v27, %v1809_v30  ;;  %v1049_v19 = vld [vmem:[#allocation2 + $0xf9] sm:$0xff] }
  0x67   : > { %v505_v40 = vadd.f32 %v473_v14, %v371_v13  ;;  %v1217_v29 = vadd.f32 %v1185_v61, %v1115_v17  ;;  %v1014_v62 = vadd.f32 %v982_v60, %v911_v16  ;;  %v372_v31 = vmul.f32 %v1585_v22, %v943_v20  ;;  %v1151_v17 = vld [vmem:[#allocation2 + $0xfa] sm:$0xff] }
  0x68   : > { %v810_v33 = vadd.f32 %v778_v18, %v708_v32  ;;  %v1085_v46 = vmul.f32 %v1649_v49, %v1047_v28  ;;  %v677_v51 = vmul.f32 %v1618_v34, %v944_v58  ;;  %v474_v57 = vmul.f32 %v1596_v26, %v1045_v56 }
  0x69   : > { %v607_v47 = vadd.f32 %v575_v23, %v505_v40  ;;  %1249 = vst.msk [vmem:[%s1690_s14 + $0x68] sm:$0xff] %vm189_vm0, %v1217_v29  ;;  %v1116_v41 = vadd.f32 %v1084_v25, %v1014_v62  ;;  %v1187_v37 = vmul.f32 %v1654_v50, %v1149_v39  ;;  %v779_v30 = vmul.f32 %v1631_v42, %v1046_v59  ;;  %v1050_v62 = vld [vmem:[#allocation2 + $0x109] sm:$0xff] }
  0x6a   : > { %v912_v35 = vadd.f32 %v880_v10, %v810_v33  ;;  %v881_v20 = vmul.f32 %v1636_v43, %v1834_v1  ;;  %v506_v53 = vadd.f32 %v474_v57, %v372_v31  ;;  %v576_v3 = vmul.f32 %v1601_v27, %v1147_v2  ;;  %v1888_v33 = vld [vmem:[#allocation2 + $0x10a] sm:$0xff] }
  0x6b   : > { %v709_v44 = vadd.f32 %v677_v51, %v607_v47  ;;  %v1218_v56 = vadd.f32 %v1186_v7, %v1116_v41  ;;  %v984_v55 = vmul.f32 %v1644_v48, %v946_v38  ;;  %v373_v45 = vmul.f32 %v1585_v22, %v944_v58  ;;  %v947_v58 = vld [vmem:[#allocation2 + $0xf8] sm:$0xff] }
  0x6c   : > { %v1015_v54 = vadd.f32 %v983_v36, %v912_v35  ;;  %v608_v6 = vadd.f32 %v576_v3, %v506_v53  ;;  %v678_v11 = vmul.f32 %v1618_v34, %v945_v24  ;;  %v475_v12 = vmul.f32 %v1596_v26, %v1046_v59 }
  0x6d   : > { %v811_v4 = vadd.f32 %v779_v30, %v709_v44  ;;  %1250 = vst.msk [vmem:[%s1690_s14 + $0x70] sm:$0xff] %vm189_vm0, %v1218_v56  ;;  %v1086_v61 = vmul.f32 %v1649_v49, %v1048_v52  ;;  %v1188_v2 = vmul.f32 %v1654_v50, %v1863_v0  ;;  %v780_v9 = vmul.f32 %v1631_v42, %v1047_v28 }
  0x6e   : > { %v1117_v63 = vadd.f32 %v1085_v46, %v1015_v54  ;;  %v710_v13 = vadd.f32 %v678_v11, %v608_v6  ;;  %v507_v5 = vadd.f32 %v475_v12, %v373_v45  ;;  %v577_v8 = vmul.f32 %v1601_v27, %v1834_v1  ;;  %v1153_v6 = vld [vmem:[#allocation2 + $0x112] sm:$0xff] }
  0x6f   : > { %v913_v15 = vadd.f32 %v881_v20, %v811_v4  ;;  %v882_v21 = vmul.f32 %v1636_v43, %v1149_v39  ;;  %v679_v60 = vmul.f32 %v1618_v34, %v946_v38  ;;  %v374_v25 = vmul.f32 %v1585_v22, %v945_v24  ;;  %v948_v24 = vld [vmem:[#allocation2 + $0x108] sm:$0xff] }
  0x70   : > { %v1219_v59 = vadd.f32 %v1187_v37, %v1117_v63  ;;  %v812_v14 = vadd.f32 %v780_v9, %v710_v13  ;;  %v609_v16 = vadd.f32 %v577_v8, %v507_v5  ;;  %v476_v32 = vmul.f32 %v1596_v26, %v1047_v28  ;;  %v949_v37 = vld [vmem:[#allocation2 + $0x110] sm:$0xff]  ;;  %v950_v5 = vld [vmem:[#allocation2 + $0x120] sm:$0xff] }
  0x71   : > { %v1016_v7 = vadd.f32 %v984_v55, %v913_v15  ;;  %v985_v18 = vmul.f32 %v1644_v48, %v947_v58  ;;  %v1087_v10 = vmul.f32 %v1649_v49, %v1049_v19  ;;  %v781_v1 = vmul.f32 %v1631_v42, %v1048_v52  ;;  %v1051_v55 = vld [vmem:[#allocation2 + $0x111] sm:$0xff] }
  0x72   : > { %1251 = vst.msk [vmem:[%s1690_s14 + $0x78] sm:$0xff] %vm189_vm0, %v1219_v59  ;;  %v578_v36 = vmul.f32 %v1601_v27, %v1149_v39  ;;  %v914_v23 = vadd.f32 %v882_v21, %v812_v14  ;;  %v711_v29 = vadd.f32 %v679_v60, %v609_v16  ;;  %v508_v31 = vadd.f32 %v476_v32, %v374_v25  ;;  %v1917_v14 = vld [vmem:[#allocation2 + $0x122] sm:$0xff] }
  0x73   : > { %v1118_v40 = vadd.f32 %v1086_v61, %v1016_v7  ;;  %v1189_v28 = vmul.f32 %v1654_v50, %v1151_v17  ;;  %v883_v46 = vmul.f32 %v1636_v43, %v1863_v0  ;;  %v680_v47 = vmul.f32 %v1618_v34, %v947_v58  ;;  %v1052_v7 = vld [vmem:[#allocation2 + $0x121] sm:$0xff] }
  0x74   : > { %v375_v51 = vmul.f32 %v1585_v22, %v946_v38  ;;  %v1017_v39 = vadd.f32 %v985_v18, %v914_v23  ;;  %v813_v41 = vadd.f32 %v781_v1, %v711_v29  ;;  %v610_v35 = vadd.f32 %v578_v36, %v508_v31 }
  0x75   : > { %v1220_v57 = vadd.f32 %v1188_v2, %v1118_v40  ;;  %v986_v30 = vmul.f32 %v1644_v48, %v948_v24  ;;  %v1088_v44 = vmul.f32 %v1649_v49, %v1050_v62  ;;  %v1190_v20 = vmul.f32 %v1654_v50, %v1888_v33 }
  0x76   : > { %v477_v53 = vmul.f32 %v1596_v26, %v1048_v52  ;;  %v1119_v3 = vadd.f32 %v1087_v10, %v1017_v39  ;;  %v915_v56 = vadd.f32 %v883_v46, %v813_v41  ;;  %v712_v54 = vadd.f32 %v680_v47, %v610_v35 }
  0x77   : > { %1252 = vst.msk [vmem:[%s1690_s14 + $0x80] sm:$0xff] %vm189_vm0, %v1220_v57  ;;  %v782_v38 = vmul.f32 %v1631_v42, %v1049_v19  ;;  %v884_v45 = vmul.f32 %v1636_v43, %v1151_v17  ;;  %v987_v4 = vmul.f32 %v1644_v48, %v949_v37  ;;  %v579_v12 = vmul.f32 %v1601_v27, %v1863_v0  ;;  %v1053_v57 = vld [vmem:[#allocation2 + $0x129] sm:$0xff] }
  0x78   : > { %v509_v11 = vadd.f32 %v477_v53, %v375_v51  ;;  %v1221_v63 = vadd.f32 %v1189_v28, %v1119_v3  ;;  %v1018_v52 = vadd.f32 %v986_v30, %v915_v56  ;;  %v376_v2 = vmul.f32 %v1585_v22, %v947_v58  ;;  %v1935_v3 = vld [vmem:[#allocation2 + $0x12a] sm:$0xff] }
  0x79   : > { %v814_v61 = vadd.f32 %v782_v38, %v712_v54  ;;  %v1089_v9 = vmul.f32 %v1649_v49, %v1051_v55  ;;  %v681_v13 = vmul.f32 %v1618_v34, %v948_v24  ;;  %v478_v8 = vmul.f32 %v1596_v26, %v1049_v19 }
  0x7a   : > { %v611_v15 = vadd.f32 %v579_v12, %v509_v11  ;;  %1253 = vst.msk [vmem:[%s1690_s14 + $0x88] sm:$0xff] %vm189_vm0, %v1221_v63  ;;  %v1120_v59 = vadd.f32 %v1088_v44, %v1018_v52  ;;  %v1191_v60 = vmul.f32 %v1654_v50, %v1153_v6  ;;  %v783_v0 = vmul.f32 %v1631_v42, %v1050_v62  ;;  %v1054_v63 = vld [vmem:[#allocation2 + $0x139] sm:$0xff] }
  0x7b   : > { %v916_v21 = vadd.f32 %v884_v45, %v814_v61  ;;  %v885_v58 = vmul.f32 %v1636_v43, %v1888_v33  ;;  %v510_v16 = vadd.f32 %v478_v8, %v376_v2  ;;  %v580_v32 = vmul.f32 %v1601_v27, %v1151_v17  ;;  %v1944_v52 = vld [vmem:[#allocation2 + $0x13a] sm:$0xff] }
  0x7c   : > { %v713_v25 = vadd.f32 %v681_v13, %v611_v15  ;;  %v1222_v19 = vadd.f32 %v1190_v20, %v1120_v59  ;;  %v988_v10 = vmul.f32 %v1644_v48, %v950_v5  ;;  %v377_v1 = vmul.f32 %v1585_v22, %v948_v24  ;;  %v951_v24 = vld [vmem:[#allocation2 + $0x128] sm:$0xff]  ;;  %v1957_v59 = vld [vmem:[#allocation2 + $0x140] sm:$0xff] }
  0x7d   : > { %v1019_v18 = vadd.f32 %v987_v4, %v916_v21  ;;  %v612_v40 = vadd.f32 %v580_v32, %v510_v16  ;;  %v682_v23 = vmul.f32 %v1618_v34, %v949_v37  ;;  %v479_v29 = vmul.f32 %v1596_v26, %v1050_v62 }
  0x7e   : > { %v815_v36 = vadd.f32 %v783_v0, %v713_v25  ;;  %1254 = vst.msk [vmem:[%s1690_s14 + $0x90] sm:$0xff] %vm189_vm0, %v1222_v19  ;;  %v1090_v28 = vmul.f32 %v1649_v49, %v1052_v7  ;;  %v1192_v17 = vmul.f32 %v1654_v50, %v1917_v14  ;;  %v784_v46 = vmul.f32 %v1631_v42, %v1051_v55  ;;  %v1966_v0 = vld [vmem:[%s2126_s1 + $0x1] ss:$0 sm:$0xff] }
  0x7f   : > { %v1121_v31 = vadd.f32 %v1089_v9, %v1019_v18  ;;  %v714_v51 = vadd.f32 %v682_v23, %v612_v40  ;;  %v511_v39 = vadd.f32 %v479_v29, %v377_v1  ;;  %v581_v41 = vmul.f32 %v1601_v27, %v1888_v33  ;;  %v1055_v19 = vld [vmem:[#allocation2 + $0x141] sm:$0xff] }
  0x80   : > { %v917_v47 = vadd.f32 %v885_v58, %v815_v36  ;;  %v886_v35 = vmul.f32 %v1636_v43, %v1153_v6  ;;  %v683_v30 = vmul.f32 %v1618_v34, %v950_v5  ;;  %v378_v44 = vmul.f32 %v1585_v22, %v949_v37  ;;  %v952_v37 = vld [vmem:[#allocation2 + $0x138] sm:$0xff]  ;;  %v1157_v1 = vld [vmem:[#allocation2 + $0x142] sm:$0xff] }
  0x81   : > { %v1223_v62 = vadd.f32 %v1191_v60, %v1121_v31  ;;  %v816_v53 = vadd.f32 %v784_v46, %v714_v51  ;;  %v613_v56 = vadd.f32 %v581_v41, %v511_v39  ;;  %v480_v54 = vmul.f32 %v1596_v26, %v1051_v55  ;;  %v954_v46 = vld [vmem:[#allocation2 + $0x150] sm:$0xff] }
  0x82   : > { %v1020_v20 = vadd.f32 %v988_v10, %v917_v47  ;;  %v989_v38 = vmul.f32 %v1644_v48, %v951_v24  ;;  %v1091_v33 = vmul.f32 %v1649_v49, %v1053_v57  ;;  %v785_v45 = vmul.f32 %v1631_v42, %v1052_v7 }
  0x83   : > { %1255 = vst.msk [vmem:[%s1690_s14 + $0x98] sm:$0xff] %vm189_vm0, %v1223_v62  ;;  %v582_v4 = vmul.f32 %v1601_v27, %v1153_v6  ;;  %v918_v12 = vadd.f32 %v886_v35, %v816_v53  ;;  %v715_v22 = vadd.f32 %v683_v30, %v613_v56  ;;  %v512_v61 = vadd.f32 %v480_v54, %v378_v44  ;;  %v1954_v27 = vld [vmem:[%s2126_s1] ss:$0 sm:$0xff]  ;;  %v2004_v62 = vld [vmem:[%s2126_s1 + $0x5] ss:$0 sm:$0xff]  ;;  %v1056_v35 = vld [vmem:[#allocation2 + $0x151] sm:$0xff] }
  0x84   : > { %v1122_v11 = vadd.f32 %v1090_v28, %v1020_v20  ;;  %v1193_v26 = vmul.f32 %v1654_v50, %v1935_v3  ;;  %v887_v55 = vmul.f32 %v1636_v43, %v1917_v14  ;;  %v684_v2 = vmul.f32 %v1618_v34, %v951_v24  ;;  %v2008_v30 = vld [vmem:[#allocation2 + $0x152] sm:$0xff]  ;;  %v2015_v56 = vld [vmem:[%s2126_s1 + $0x6] ss:$0 sm:$0xff] }
  0x85   : > { %v379_v6 = vmul.f32 %v1954_v27, %v950_v5  ;;  %v1021_v15 = vadd.f32 %v989_v38, %v918_v12  ;;  %v817_v13 = vadd.f32 %v785_v45, %v715_v22  ;;  %v614_v8 = vadd.f32 %v582_v4, %v512_v61  ;;  %v2027_v12 = vld [vmem:[%s2126_s1 + $0x7] ss:$0 sm:$0xff] }
  0x86   : > { %v1224_v9 = vadd.f32 %v1192_v17, %v1122_v11  ;;  %v990_v21 = vmul.f32 %v1644_v48, %v952_v37  ;;  %v1092_v60 = vmul.f32 %v1649_v49, %v1054_v63  ;;  %v1194_v34 = vmul.f32 %v1654_v50, %v1944_v52 }
  0x87   : > { %v481_v5 = vmul.f32 %v1966_v0, %v1052_v7  ;;  %v1123_v25 = vadd.f32 %v1091_v33, %v1021_v15  ;;  %v919_v58 = vadd.f32 %v887_v55, %v817_v13  ;;  %v716_v16 = vadd.f32 %v684_v2, %v614_v8  ;;  %v1979_v7 = vld [vmem:[%s2126_s1 + $0x2] ss:$0 sm:$0xff]  ;;  %v955_v2 = vld [vmem:[#allocation2 + $0x158] sm:$0xff] }
  0x88   : > { %1256 = vst.msk [vmem:[%s1690_s14 + $0xa0] sm:$0xff] %vm189_vm0, %v1224_v9  ;;  %v786_v32 = vmul.f32 %v1631_v42, %v1053_v57  ;;  %v888_v18 = vmul.f32 %v1636_v43, %v1935_v3  ;;  %v991_v10 = vmul.f32 %v1644_v48, %v1957_v59  ;;  %v583_v40 = vmul.f32 %v1979_v7, %v1917_v14  ;;  %v1988_v48 = vld [vmem:[%s2126_s1 + $0x3] ss:$0 sm:$0xff] }
  0x89   : > { %v513_v36 = vadd.f32 %v481_v5, %v379_v6  ;;  %v1225_v23 = vadd.f32 %v1193_v26, %v1123_v25  ;;  %v1022_v42 = vadd.f32 %v990_v21, %v919_v58  ;;  %v380_v31 = vmul.f32 %v1954_v27, %v951_v24  ;;  %v1057_v6 = vld [vmem:[#allocation2 + $0x159] sm:$0xff] }
  0x8a   : > { %v818_v29 = vadd.f32 %v786_v32, %v716_v16  ;;  %v1093_v43 = vmul.f32 %v1649_v49, %v1055_v19  ;;  %v685_v17 = vmul.f32 %v1988_v48, %v952_v37  ;;  %v482_v47 = vmul.f32 %v1966_v0, %v1053_v57  ;;  %v1998_v49 = vld [vmem:[%s2126_s1 + $0x4] ss:$0 sm:$0xff]  ;;  %v1159_v25 = vld [vmem:[#allocation2 + $0x15a] sm:$0xff] }
  0x8b   : > { %v615_v28 = vadd.f32 %v583_v40, %v513_v36  ;;  %1257 = vst.msk [vmem:[%s1690_s14 + $0xa8] sm:$0xff] %vm189_vm0, %v1225_v23  ;;  %v1124_v14 = vadd.f32 %v1092_v60, %v1022_v42  ;;  %v1195_v39 = vmul.f32 %v1654_v50, %v1157_v1  ;;  %v787_v24 = vmul.f32 %v1998_v49, %v1054_v63  ;;  %v1058_v42 = vld [vmem:[#allocation2 + $0x169] sm:$0xff] }
  0x8c   : > { %v920_v51 = vadd.f32 %v888_v18, %v818_v29  ;;  %v889_v57 = vmul.f32 %v2004_v62, %v1944_v52  ;;  %v514_v50 = vadd.f32 %v482_v47, %v380_v31  ;;  %v584_v44 = vmul.f32 %v1979_v7, %v1935_v3  ;;  %v1160_v29 = vld [vmem:[#allocation2 + $0x16a] sm:$0xff] }
  0x8d   : > { %v717_v41 = vadd.f32 %v685_v17, %v615_v28  ;;  %v1226_v20 = vadd.f32 %v1194_v34, %v1124_v14  ;;  %v992_v54 = vmul.f32 %v2015_v56, %v954_v46  ;;  %v381_v38 = vmul.f32 %v1954_v27, %v952_v37  ;;  %v2033_v37 = vld [vmem:[%s2126_s1 + $0x8] ss:$0 sm:$0xff] }
  0x8e   : > { %v1023_v53 = vadd.f32 %v991_v10, %v920_v51  ;;  %v616_v45 = vadd.f32 %v584_v44, %v514_v50  ;;  %v686_v4 = vmul.f32 %v1988_v48, %v1957_v59  ;;  %v483_v11 = vmul.f32 %v1966_v0, %v1054_v63 }
  0x8f   : > { %v819_v33 = vadd.f32 %v787_v24, %v717_v41  ;;  %1258 = vst.msk [vmem:[%s1690_s14 + $0xb0] sm:$0xff] %vm189_vm0, %v1226_v20  ;;  %v1094_v22 = vmul.f32 %v2027_v12, %v1056_v35  ;;  %v1196_v61 = vmul.f32 %v2033_v37, %v2008_v30  ;;  %v788_v63 = vmul.f32 %v1998_v49, %v1055_v19 }
  0x90   : > { %v1125_v3 = vadd.f32 %v1093_v43, %v1023_v53  ;;  %v718_v55 = vadd.f32 %v686_v4, %v616_v45  ;;  %v515_v9 = vadd.f32 %v483_v11, %v381_v38  ;;  %v585_v15 = vmul.f32 %v1979_v7, %v1944_v52  ;;  %v1161_v45 = vld [vmem:[#allocation2 + $0x172] sm:$0xff] }
  0x91   : > { %v921_v26 = vadd.f32 %v889_v57, %v819_v33  ;;  %v890_v8 = vmul.f32 %v2004_v62, %v1157_v1  ;;  %v687_v21 = vmul.f32 %v1988_v48, %v954_v46  ;;  %v382_v60 = vmul.f32 %v1954_v27, %v1957_v59  ;;  %v956_v59 = vld [vmem:[#allocation2 + $0x168] sm:$0xff] }
  0x92   : > { %v1227_v13 = vadd.f32 %v1195_v39, %v1125_v3  ;;  %v820_v5 = vadd.f32 %v788_v63, %v718_v55  ;;  %v617_v58 = vadd.f32 %v585_v15, %v515_v9  ;;  %v484_v16 = vmul.f32 %v1966_v0, %v1055_v19  ;;  %v957_v39 = vld [vmem:[#allocation2 + $0x170] sm:$0xff]  ;;  %v958_v9 = vld [vmem:[#allocation2 + $0x180] sm:$0xff] }
  0x93   : > { %v1024_v34 = vadd.f32 %v992_v54, %v921_v26  ;;  %v993_v32 = vmul.f32 %v2015_v56, %v955_v2  ;;  %v1095_v52 = vmul.f32 %v2027_v12, %v1057_v6  ;;  %v789_v18 = vmul.f32 %v1998_v49, %v1056_v35  ;;  %v1059_v54 = vld [vmem:[#allocation2 + $0x171] sm:$0xff] }
  0x94   : > { %1259 = vst.msk [vmem:[%s1690_s14 + $0xb8] sm:$0xff] %vm189_vm0, %v1227_v13  ;;  %v586_v10 = vmul.f32 %v1979_v7, %v1157_v1  ;;  %v922_v40 = vadd.f32 %v890_v8, %v820_v5  ;;  %v719_v23 = vadd.f32 %v687_v21, %v617_v58  ;;  %v516_v31 = vadd.f32 %v484_v16, %v382_v60 }
  0x95   : > { %v1126_v36 = vadd.f32 %v1094_v22, %v1024_v34  ;;  %v1197_v19 = vmul.f32 %v2033_v37, %v1159_v25  ;;  %v891_v43 = vmul.f32 %v2004_v62, %v2008_v30  ;;  %v688_v28 = vmul.f32 %v1988_v48, %v955_v2  ;;  %v1060_v34 = vld [vmem:[#allocation2 + $0x181] sm:$0xff] }
  0x96   : > { %v383_v17 = vmul.f32 %v1954_v27, %v954_v46  ;;  %v1025_v14 = vadd.f32 %v993_v32, %v922_v40  ;;  %v821_v1 = vadd.f32 %v789_v18, %v719_v23  ;;  %v618_v51 = vadd.f32 %v586_v10, %v516_v31  ;;  %v1162_v10 = vld [vmem:[#allocation2 + $0x182] sm:$0xff] }
  0x97   : > { %v1228_v47 = vadd.f32 %v1196_v61, %v1126_v36  ;;  %v994_v24 = vmul.f32 %v2015_v56, %v956_v59  ;;  %v1096_v41 = vmul.f32 %v2027_v12, %v1058_v42  ;;  %v1198_v57 = vmul.f32 %v2033_v37, %v1160_v29 }
  0x98   : > { %v485_v50 = vmul.f32 %v1966_v0, %v1056_v35  ;;  %v1127_v44 = vadd.f32 %v1095_v52, %v1025_v14  ;;  %v923_v20 = vadd.f32 %v891_v43, %v821_v1  ;;  %v720_v53 = vadd.f32 %v688_v28, %v618_v51 }
  0x99   : > { %1260 = vst.msk [vmem:[%s1690_s14 + $0xc0] sm:$0xff] %vm189_vm0, %v1228_v47  ;;  %v790_v46 = vmul.f32 %v1998_v49, %v1057_v6  ;;  %v892_v38 = vmul.f32 %v2004_v62, %v1159_v25  ;;  %v995_v33 = vmul.f32 %v2015_v56, %v957_v39  ;;  %v587_v11 = vmul.f32 %v1979_v7, %v2008_v30 }
  0x9a   : > { %v517_v4 = vadd.f32 %v485_v50, %v383_v17  ;;  %v1229_v3 = vadd.f32 %v1197_v19, %v1127_v44  ;;  %v1026_v35 = vadd.f32 %v994_v24, %v923_v20  ;;  %v384_v61 = vmul.f32 %v1954_v27, %v955_v2  ;;  %v1061_v50 = vld [vmem:[#allocation2 + $0x189] sm:$0xff]  ;;  %v960_v20 = vld [vmem:[#allocation2 + $0x198] sm:$0xff] }
  0x9b   : > { %v822_v22 = vadd.f32 %v790_v46, %v720_v53  ;;  %v1097_v63 = vmul.f32 %v2027_v12, %v1059_v54  ;;  %v689_v55 = vmul.f32 %v1988_v48, %v956_v59  ;;  %v486_v15 = vmul.f32 %v1966_v0, %v1057_v6 }
  0x9c   : > { %v619_v26 = vadd.f32 %v587_v11, %v517_v4  ;;  %1261 = vst.msk [vmem:[%s1690_s14 + $0xc8] sm:$0xff] %vm189_vm0, %v1229_v3  ;;  %v1128_v13 = vadd.f32 %v1096_v41, %v1026_v35  ;;  %v1199_v21 = vmul.f32 %v2033_v37, %v1161_v45  ;;  %v791_v30 = vmul.f32 %v1998_v49, %v1058_v42 }
  0x9d   : > { %v924_v8 = vadd.f32 %v892_v38, %v822_v22  ;;  %v893_v2 = vmul.f32 %v2004_v62, %v1160_v29  ;;  %v518_v5 = vadd.f32 %v486_v15, %v384_v61  ;;  %v588_v58 = vmul.f32 %v1979_v7, %v1159_v25 }
  0x9e   : > { %v721_v60 = vadd.f32 %v689_v55, %v619_v26  ;;  %v1230_v16 = vadd.f32 %v1198_v57, %v1128_v13  ;;  %v996_v6 = vmul.f32 %v2015_v56, %v958_v9  ;;  %v385_v52 = vmul.f32 %v1954_v27, %v956_v59  ;;  %v959_v59 = vld [vmem:[#allocation2 + $0x188] sm:$0xff]  ;;  %v1062_v26 = vld [vmem:[#allocation2 + $0x199] sm:$0xff] }
  0x9f   : > { %v1027_v32 = vadd.f32 %v995_v33, %v924_v8  ;;  %v620_v36 = vadd.f32 %v588_v58, %v518_v5  ;;  %v690_v40 = vmul.f32 %v1988_v48, %v957_v39  ;;  %v487_v23 = vmul.f32 %v1966_v0, %v1058_v42  ;;  %v1063_v58 = vld [vmem:[#allocation2 + $0x1a1] sm:$0xff] }
  0xa0   : > { %v823_v18 = vadd.f32 %v791_v30, %v721_v60  ;;  %1262 = vst.msk [vmem:[%s1690_s14 + $0xd0] sm:$0xff] %vm189_vm0, %v1230_v16  ;;  %v1098_v19 = vmul.f32 %v2027_v12, %v1060_v34  ;;  %v792_v25 = vmul.f32 %v1998_v49, %v1059_v54  ;;  %v589_v43 = vmul.f32 %v1979_v7, %v1160_v29 }
  0xa1   : > { %v1129_v31 = vadd.f32 %v1097_v63, %v1027_v32  ;;  %v722_v17 = vadd.f32 %v690_v40, %v620_v36  ;;  %v519_v47 = vadd.f32 %v487_v23, %v385_v52  ;;  %v691_v14 = vmul.f32 %v1988_v48, %v958_v9 }
  0xa2   : > { %v925_v28 = vadd.f32 %v893_v2, %v823_v18  ;;  %v1200_v51 = vmul.f32 %v2033_v37, %v1162_v10  ;;  %v894_v42 = vmul.f32 %v2004_v62, %v1161_v45  ;;  %v386_v24 = vmul.f32 %v1954_v27, %v957_v39  ;;  %v1163_v39 = vld [vmem:[#allocation2 + $0x18a] sm:$0xff] }
  0xa3   : > { %v1231_v1 = vadd.f32 %v1199_v21, %v1129_v31  ;;  %v824_v57 = vadd.f32 %v792_v25, %v722_v17  ;;  %v621_v44 = vadd.f32 %v589_v43, %v519_v47  ;;  %v488_v29 = vmul.f32 %v1966_v0, %v1059_v54  ;;  %v1164_v21 = vld [vmem:[#allocation2 + $0x19a] sm:$0xff] }
  0xa4   : > { %v1028_v41 = vadd.f32 %v996_v6, %v925_v28  ;;  %v997_v53 = vmul.f32 %v2015_v56, %v959_v59  ;;  %v793_v46 = vmul.f32 %v1998_v49, %v1060_v34  ;;  %v590_v38 = vmul.f32 %v1979_v7, %v1161_v45 }
  0xa5   : > { %1263 = vst.msk [vmem:[%s1690_s14 + $0xd8] sm:$0xff] %vm189_vm0, %v1231_v1  ;;  %v692_v33 = vmul.f32 %v1988_v48, %v959_v59  ;;  %v926_v27 = vadd.f32 %v894_v42, %v824_v57  ;;  %v723_v11 = vadd.f32 %v691_v14, %v621_v44  ;;  %v520_v3 = vadd.f32 %v488_v29, %v386_v24  ;;  %v961_v48 = vld [vmem:[#allocation2 + $0x1a0] sm:$0xff] }
  0xa6   : > { %v1130_v4 = vadd.f32 %v1098_v19, %v1028_v41  ;;  %v1099_v35 = vmul.f32 %v2027_v12, %v1061_v50  ;;  %v895_v0 = vmul.f32 %v2004_v62, %v1162_v10  ;;  %v998_v54 = vmul.f32 %v2015_v56, %v960_v20 }
  0xa7   : > { %v1029_v61 = vadd.f32 %v997_v53, %v926_v27  ;;  %v825_v63 = vadd.f32 %v793_v46, %v723_v11  ;;  %v622_v55 = vadd.f32 %v590_v38, %v520_v3  ;;  %v1201_v7 = vmul.f32 %v2033_v37, %v1163_v39 }
  0xa8   : > { %v1232_v22 = vadd.f32 %v1200_v51, %v1130_v4  ;;  %v794_v13 = vmul.f32 %v1998_v49, %v1061_v50  ;;  %v1100_v8 = vmul.f32 %v2027_v12, %v1062_v26  ;;  %v896_v30 = vmul.f32 %v2004_v62, %v1163_v39  ;;  %v1165_v49 = vld [vmem:[#allocation2 + $0x1a2] sm:$0xff] }
  0xa9   : > { %v1131_v45 = vadd.f32 %v1099_v35, %v1029_v61  ;;  %v927_v9 = vadd.f32 %v895_v0, %v825_v63  ;;  %v724_v15 = vadd.f32 %v692_v33, %v622_v55  ;;  %v999_v5 = vmul.f32 %v2015_v56, %v961_v48 }
  0xaa   : > { %1264 = vst.msk [vmem:[%s1690_s14 + $0xe0] sm:$0xff] %vm189_vm0, %v1232_v22  ;;  %v1202_v32 = vmul.f32 %v2033_v37, %v1164_v21  ;;  %v1101_v10 = vmul.f32 %v2027_v12, %v1063_v58  ;;  %v1203_v36 = vmul.f32 %v2033_v37, %v1165_v49 }
  0xab   : > { %v1233_v60 = vadd.f32 %v1201_v7, %v1131_v45  ;;  %v1030_v2 = vadd.f32 %v998_v54, %v927_v9  ;;  %v826_v34 = vadd.f32 %v794_v13, %v724_v15 }
  0xad   : > { %1265 = vst.msk [vmem:[%s1690_s14 + $0xe8] sm:$0xff] %vm189_vm0, %v1233_v60  ;;  %v1132_v16 = vadd.f32 %v1100_v8, %v1030_v2  ;;  %v928_v6 = vadd.f32 %v896_v30, %v826_v34 }
  0xaf   : > { %v1234_v52 = vadd.f32 %v1202_v32, %v1132_v16  ;;  %v1031_v18 = vadd.f32 %v999_v5, %v928_v6 }
  0xb1   : > { %1266 = vst.msk [vmem:[%s1690_s14 + $0xf0] sm:$0xff] %vm189_vm0, %v1234_v52  ;;  %v1133_v62 = vadd.f32 %v1101_v10, %v1031_v18 }
  0xb3   : > { %v1235_v40 = vadd.f32 %v1203_v36, %v1133_v62 }
  0xb5   : > { %1267 = vst.msk [vmem:[%s1690_s14 + $0xf8] sm:$0xff] %vm189_vm0, %v1235_v40 }
  0xb6 PF: > { %s12_s11 = sadd.s32 1, %s1451_s11   ;;  %s2128_s9 = smov %s1447_s10 }
  0xb7   : > { %p9_p5 = scmp.ge.s32.totalorder %s12_s11, 4   ;;  %s2129_s10 = smov %s2131_s12 }
  0xb9   :  { %11 = sbr.rel (!%p9_p5) target bundleno = 2 (0x2), region = 72 }

</bundles_post_ra>
